<compile_context>
chip_gen: v6e
topology: v6e:2x2x1
jax: 0.10.0
libtpu: 0.0.40
codegen_flags: <defaults>
</compile_context>

<pallas_src>
import jax
import jax.numpy as jnp
import numpy as np
from jax.experimental import pallas as pl
from jax.experimental.pallas import tpu as pltpu


def upbasicblock_kernel(x_ref, w1_ref, w2_ref, b1_ref, b2_ref, out_ref):
    # x_ref : (1, H, W, Cp)   bf16  input tile (one batch element), channel-padded
    # w1_ref: (Cp, Cp)        bf16  1x1 conv weight with BN1 scale folded in
    # w2_ref: (3, 3, Cp, Cp)  bf16  3x3 conv weight (HWIO) with BN2 scale folded in
    # b1_ref, b2_ref: (1, Cp) f32   folded BN biases
    # out_ref: (1, H, W, Cp)  f32
    _, H, W, Cp = x_ref.shape

    xb = x_ref[0].reshape(H * W, Cp)                     # bf16, layout-preserving

    # --- conv1 (1x1) + bn1 bias + relu (scale already folded into w1) ---
    y = jnp.dot(xb, w1_ref[...], preferred_element_type=jnp.float32)
    y = jnp.maximum(y + b1_ref[...], 0.0)
    yb = y.astype(jnp.bfloat16).reshape(H, W, Cp)

    # --- conv2 (3x3, stride 1, pad 1) without a padded scratch ref ---
    # Zero-pad one row top/bottom (tile-aligned concat along H) and build the
    # three W-shifted variants once; each of the 9 taps is then a tile-aligned
    # slice along H feeding a K=Cp MXU matmul.
    zrow = jnp.zeros((1, W, Cp), jnp.bfloat16)
    vp = jnp.concatenate([zrow, yb, zrow], axis=0)       # (H+2, W, Cp)
    zcol = jnp.zeros((H + 2, 1, Cp), jnp.bfloat16)
    u = (jnp.concatenate([zcol, vp[:, :W - 1, :]], axis=1),   # kx = 0  (w-1)
         vp,                                                  # kx = 1  (w)
         jnp.concatenate([vp[:, 1:, :], zcol], axis=1))       # kx = 2  (w+1)

    # fp32 accumulator seeded with residual (reuses xb) + bn2 bias.
    acc = xb.astype(jnp.float32) + b2_ref[...]
    for ky in range(3):
        for kx in range(3):
            tap = u[kx][ky:ky + H].reshape(H * W, Cp)    # aligned slice, free reshape
            acc = acc + jnp.dot(tap, w2_ref[ky, kx],
                                preferred_element_type=jnp.float32)

    out_ref[...] = jnp.maximum(acc, 0.0).reshape(1, H, W, Cp).astype(out_ref.dtype)


def upbasicblock_pallas(x_nhwc, w1, w2, s1, b1, s2, b2):
    N, H, W, Cin = x_nhwc.shape
    C = w1.shape[1]
    assert Cin == C, "upsample=None path requires inplanes == planes"
    # TODO(synk): upsample branch (residual = upsample(x) conv_out) not implemented.

    Cp = ((C + 127) // 128) * 128        # lane-dense channel padding
    pc = Cp - C

    # Fold BN scales into the conv weights (exact: BN is affine on conv output).
    w1f = (w1 * s1).astype(jnp.bfloat16)                          # (Cin, C)
    w2f = (w2 * s2.reshape(1, 1, 1, C)).astype(jnp.bfloat16)      # (3,3,Cin,C)

    xp = jnp.pad(x_nhwc, ((0, 0), (0, 0), (0, 0), (0, pc))).astype(jnp.bfloat16)
    w1p = jnp.pad(w1f, ((0, pc), (0, pc)))
    w2p = jnp.pad(w2f, ((0, 0), (0, 0), (0, pc), (0, pc)))
    b1p = jnp.pad(b1, ((0, 0), (0, pc))).astype(jnp.float32)
    b2p = jnp.pad(b2, ((0, 0), (0, pc))).astype(jnp.float32)

    kernel = pl.pallas_call(
        upbasicblock_kernel,
        out_shape=jax.ShapeDtypeStruct((N, H, W, Cp), jnp.float32),
        grid_spec=pltpu.PrefetchScalarGridSpec(
            num_scalar_prefetch=0,
            grid=(N,),
            in_specs=[
                pl.BlockSpec((1, H, W, Cp), lambda n: (n, 0, 0, 0)),
                pl.BlockSpec((Cp, Cp), lambda n: (0, 0)),
                pl.BlockSpec((3, 3, Cp, Cp), lambda n: (0, 0, 0, 0)),
                pl.BlockSpec((1, Cp), lambda n: (0, 0)),
                pl.BlockSpec((1, Cp), lambda n: (0, 0)),
            ],
            out_specs=pl.BlockSpec((1, H, W, Cp), lambda n: (n, 0, 0, 0)),
        ),
        compiler_params=pltpu.CompilerParams(
            dimension_semantics=("parallel",),
            vmem_limit_bytes=64 * 1024 * 1024),
    )
    # TODO(synk): for large H*W*C add a spatial row-tile grid axis with a 1-row
    # halo (manual DMA) so blocks fit v7x's 64 MiB VMEM and feed both TensorCores.
    out = kernel(xp, w1p, w2p, b1p, b2p)
    return out[..., :C]


def upbasicblock_reference(x_nhwc, w1, w2, s1, b1, s2, b2):
    Cin, C = w1.shape
    y = jax.lax.conv_general_dilated(
        x_nhwc, w1.reshape(1, 1, Cin, C), (1, 1), 'SAME',
        dimension_numbers=('NHWC', 'HWIO', 'NHWC'))
    y = y * s1 + b1
    y = jnp.maximum(y, 0.0)
    z = jax.lax.conv_general_dilated(
        y, w2, (1, 1), 'SAME',
        dimension_numbers=('NHWC', 'HWIO', 'NHWC'))
    z = z * s2 + b2
    return jnp.maximum(z + x_nhwc, 0.0)


def fold_bn(gamma, beta, mean, var, eps=1e-5):
    scale = gamma / jnp.sqrt(var + eps)
    bias = beta - mean * scale
    return scale.reshape(1, -1), bias.reshape(1, -1)


if __name__ == "__main__":
    # Small shapes consistent with the module: N=2, inplanes=planes=4, 16x16.
    N, C, H, W = 2, 4, 16, 16

    key = jax.random.PRNGKey(0)
    kx, kw1, kw2 = jax.random.split(key, 3)

    # PyTorch-style input is NCHW; kernel works in NHWC.
    x_nchw = jax.random.normal(kx, (N, C, H, W), dtype=jnp.float32)
    x_nhwc = jnp.transpose(x_nchw, (0, 2, 3, 1))

    # conv1: 1x1, (Cin, Cout); conv2: 3x3, HWIO (3, 3, Cin, Cout)
    w1 = 0.3 * jax.random.normal(kw1, (C, C), dtype=jnp.float32)
    w2 = 0.2 * jax.random.normal(kw2, (3, 3, C, C), dtype=jnp.float32)

    # Deterministic BatchNorm (eval mode) parameters, folded into affine.
    c_idx = jnp.arange(C, dtype=jnp.float32)
    s1, b1 = fold_bn(1.0 + 0.1 * c_idx, 0.05 * c_idx,
                     0.01 * c_idx, 1.0 + 0.02 * c_idx)
    s2, b2 = fold_bn(1.0 - 0.05 * c_idx, -0.03 * c_idx,
                     -0.02 * c_idx, 1.0 + 0.01 * c_idx)

    out_nhwc = upbasicblock_pallas(x_nhwc, w1, w2, s1, b1, s2, b2)
    out_nhwc = jax.block_until_ready(out_nhwc)
    out_nchw = jnp.transpose(out_nhwc, (0, 3, 1, 2))  # back to PyTorch layout

    ref_nhwc = upbasicblock_reference(x_nhwc, w1, w2, s1, b1, s2, b2)
    # bf16 matmul inputs -> slightly looser tolerance than pure fp32.
    np.testing.assert_allclose(np.asarray(out_nhwc), np.asarray(ref_nhwc),
                               rtol=2e-2, atol=2e-2)
    print("KERNEL_OK")
</pallas_src>

<mosaic_0001>
module attributes {stable_mosaic.version = 11 : i64} {
  func.func @upbasicblock_kernel(%arg0: i32, %arg1: memref<1x16x16x128xbf16, #tpu.memory_space<vmem>>, %arg2: memref<128x128xbf16, #tpu.memory_space<vmem>>, %arg3: memref<3x3x128x128xbf16, #tpu.memory_space<vmem>>, %arg4: memref<1x128xf32, #tpu.memory_space<vmem>>, %arg5: memref<1x128xf32, #tpu.memory_space<vmem>>, %arg6: memref<1x16x16x128xf32, #tpu.memory_space<vmem>>) attributes {dimension_semantics = [#tpu.dimension_semantics<parallel>], iteration_bounds = array<i64: 2>, scalar_prefetch = 0 : i64, scratch_operands = 0 : i64, tpu.core_type = #tpu.core_type<tc>, window_params = [{transform_indices = @transform_0, window_bounds = array<i64: 1, 16, 16, 128>}, {pipeline_mode = #tpu.pipeline_mode<synchronous>, transform_indices = @transform_1, window_bounds = array<i64: 128, 128>}, {pipeline_mode = #tpu.pipeline_mode<synchronous>, transform_indices = @transform_2, window_bounds = array<i64: 3, 3, 128, 128>}, {pipeline_mode = #tpu.pipeline_mode<synchronous>, transform_indices = @transform_3, window_bounds = array<i64: 1, 128>}, {pipeline_mode = #tpu.pipeline_mode<synchronous>, transform_indices = @transform_4, window_bounds = array<i64: 1, 128>}, {transform_indices = @transform_5, window_bounds = array<i64: 1, 16, 16, 128>}]} {
    %c0 = arith.constant 0 : index
    %c0_0 = arith.constant 0 : index
    %c0_1 = arith.constant 0 : index
    %c0_2 = arith.constant 0 : index
    %0 = vector.load %arg1[%c0, %c0_0, %c0_1, %c0_2] : memref<1x16x16x128xbf16, #tpu.memory_space<vmem>>, vector<1x16x16x128xbf16>
    %1 = vector.shape_cast %0 : vector<1x16x16x128xbf16> to vector<16x16x128xbf16>
    %2 = vector.shape_cast %1 : vector<16x16x128xbf16> to vector<256x128xbf16>
    %c0_3 = arith.constant 0 : index
    %c0_4 = arith.constant 0 : index
    %3 = vector.load %arg2[%c0_3, %c0_4] : memref<128x128xbf16, #tpu.memory_space<vmem>>, vector<128x128xbf16>
    %cst = arith.constant dense<0.000000e+00> : vector<256x128xf32>
    %4 = tpu.matmul %2, %3, %cst {dimension_numbers = #tpu.dot_dimension_numbers<[1], [0], [0], [1], [0, 0, 1, 1], [], []>} : vector<256x128xbf16>, vector<128x128xbf16>, vector<256x128xf32> -> vector<256x128xf32>
    %c0_5 = arith.constant 0 : index
    %c0_6 = arith.constant 0 : index
    %5 = vector.load %arg4[%c0_5, %c0_6] : memref<1x128xf32, #tpu.memory_space<vmem>>, vector<1x128xf32>
    %6 = vector.broadcast %5 : vector<1x128xf32> to vector<256x128xf32>
    %7 = arith.addf %4, %6 : vector<256x128xf32>
    %cst_7 = arith.constant 0.000000e+00 : f32
    %8 = vector.broadcast %cst_7 : f32 to vector<256x128xf32>
    %9 = arith.maximumf %7, %8 : vector<256x128xf32>
    %10 = arith.truncf %9 : vector<256x128xf32> to vector<256x128xbf16>
    %11 = vector.shape_cast %10 : vector<256x128xbf16> to vector<16x16x128xbf16>
    %cst_8 = arith.constant 0.000000e+00 : bf16
    %12 = vector.broadcast %cst_8 : bf16 to vector<1x16x128xbf16>
    %13 = tpu.concatenate %12, %11, %12 in 0 : vector<1x16x128xbf16>, vector<16x16x128xbf16>, vector<1x16x128xbf16> -> vector<18x16x128xbf16>
    %cst_9 = arith.constant 0.000000e+00 : bf16
    %14 = vector.broadcast %cst_9 : bf16 to vector<18x1x128xbf16>
    %15 = vector.extract_strided_slice %13 {offsets = [0, 0, 0], sizes = [18, 15, 128], strides = [1, 1, 1]} : vector<18x16x128xbf16> to vector<18x15x128xbf16>
    %16 = tpu.concatenate %14, %15 in 1 : vector<18x1x128xbf16>, vector<18x15x128xbf16> -> vector<18x16x128xbf16>
    %17 = vector.extract_strided_slice %13 {offsets = [0, 1, 0], sizes = [18, 15, 128], strides = [1, 1, 1]} : vector<18x16x128xbf16> to vector<18x15x128xbf16>
    %18 = tpu.concatenate %17, %14 in 1 : vector<18x15x128xbf16>, vector<18x1x128xbf16> -> vector<18x16x128xbf16>
    %19 = arith.extf %2 : vector<256x128xbf16> to vector<256x128xf32>
    %c0_10 = arith.constant 0 : index
    %c0_11 = arith.constant 0 : index
    %20 = vector.load %arg5[%c0_10, %c0_11] : memref<1x128xf32, #tpu.memory_space<vmem>>, vector<1x128xf32>
    %21 = vector.broadcast %20 : vector<1x128xf32> to vector<256x128xf32>
    %22 = arith.addf %19, %21 : vector<256x128xf32>
    %23 = vector.extract_strided_slice %16 {offsets = [0, 0, 0], sizes = [16, 16, 128], strides = [1, 1, 1]} : vector<18x16x128xbf16> to vector<16x16x128xbf16>
    %24 = vector.shape_cast %23 : vector<16x16x128xbf16> to vector<256x128xbf16>
    %c0_12 = arith.constant 0 : index
    %c0_13 = arith.constant 0 : index
    %c0_14 = arith.constant 0 : index
    %c0_15 = arith.constant 0 : index
    %25 = vector.load %arg3[%c0_12, %c0_13, %c0_14, %c0_15] : memref<3x3x128x128xbf16, #tpu.memory_space<vmem>>, vector<1x1x128x128xbf16>
    %26 = vector.shape_cast %25 : vector<1x1x128x128xbf16> to vector<128x128xbf16>
    %cst_16 = arith.constant dense<0.000000e+00> : vector<256x128xf32>
    %27 = tpu.matmul %24, %26, %cst_16 {dimension_numbers = #tpu.dot_dimension_numbers<[1], [0], [0], [1], [0, 0, 1, 1], [], []>} : vector<256x128xbf16>, vector<128x128xbf16>, vector<256x128xf32> -> vector<256x128xf32>
    %28 = arith.addf %22, %27 : vector<256x128xf32>
    %29 = vector.extract_strided_slice %13 {offsets = [0, 0, 0], sizes = [16, 16, 128], strides = [1, 1, 1]} : vector<18x16x128xbf16> to vector<16x16x128xbf16>
    %30 = vector.shape_cast %29 : vector<16x16x128xbf16> to vector<256x128xbf16>
    %c0_17 = arith.constant 0 : index
    %c1 = arith.constant 1 : index
    %c0_18 = arith.constant 0 : index
    %c0_19 = arith.constant 0 : index
    %31 = vector.load %arg3[%c0_17, %c1, %c0_18, %c0_19] : memref<3x3x128x128xbf16, #tpu.memory_space<vmem>>, vector<1x1x128x128xbf16>
    %32 = vector.shape_cast %31 : vector<1x1x128x128xbf16> to vector<128x128xbf16>
    %cst_20 = arith.constant dense<0.000000e+00> : vector<256x128xf32>
    %33 = tpu.matmul %30, %32, %cst_20 {dimension_numbers = #tpu.dot_dimension_numbers<[1], [0], [0], [1], [0, 0, 1, 1], [], []>} : vector<256x128xbf16>, vector<128x128xbf16>, vector<256x128xf32> -> vector<256x128xf32>
    %34 = arith.addf %28, %33 : vector<256x128xf32>
    %35 = vector.extract_strided_slice %18 {offsets = [0, 0, 0], sizes = [16, 16, 128], strides = [1, 1, 1]} : vector<18x16x128xbf16> to vector<16x16x128xbf16>
    %36 = vector.shape_cast %35 : vector<16x16x128xbf16> to vector<256x128xbf16>
    %c0_21 = arith.constant 0 : index
    %c2 = arith.constant 2 : index
    %c0_22 = arith.constant 0 : index
    %c0_23 = arith.constant 0 : index
    %37 = vector.load %arg3[%c0_21, %c2, %c0_22, %c0_23] : memref<3x3x128x128xbf16, #tpu.memory_space<vmem>>, vector<1x1x128x128xbf16>
    %38 = vector.shape_cast %37 : vector<1x1x128x128xbf16> to vector<128x128xbf16>
    %cst_24 = arith.constant dense<0.000000e+00> : vector<256x128xf32>
    %39 = tpu.matmul %36, %38, %cst_24 {dimension_numbers = #tpu.dot_dimension_numbers<[1], [0], [0], [1], [0, 0, 1, 1], [], []>} : vector<256x128xbf16>, vector<128x128xbf16>, vector<256x128xf32> -> vector<256x128xf32>
    %40 = arith.addf %34, %39 : vector<256x128xf32>
    %41 = vector.extract_strided_slice %16 {offsets = [1, 0, 0], sizes = [16, 16, 128], strides = [1, 1, 1]} : vector<18x16x128xbf16> to vector<16x16x128xbf16>
    %42 = vector.shape_cast %41 : vector<16x16x128xbf16> to vector<256x128xbf16>
    %c1_25 = arith.constant 1 : index
    %c0_26 = arith.constant 0 : index
    %c0_27 = arith.constant 0 : index
    %c0_28 = arith.constant 0 : index
    %43 = vector.load %arg3[%c1_25, %c0_26, %c0_27, %c0_28] : memref<3x3x128x128xbf16, #tpu.memory_space<vmem>>, vector<1x1x128x128xbf16>
    %44 = vector.shape_cast %43 : vector<1x1x128x128xbf16> to vector<128x128xbf16>
    %cst_29 = arith.constant dense<0.000000e+00> : vector<256x128xf32>
    %45 = tpu.matmul %42, %44, %cst_29 {dimension_numbers = #tpu.dot_dimension_numbers<[1], [0], [0], [1], [0, 0, 1, 1], [], []>} : vector<256x128xbf16>, vector<128x128xbf16>, vector<256x128xf32> -> vector<256x128xf32>
    %46 = arith.addf %40, %45 : vector<256x128xf32>
    %47 = vector.extract_strided_slice %13 {offsets = [1, 0, 0], sizes = [16, 16, 128], strides = [1, 1, 1]} : vector<18x16x128xbf16> to vector<16x16x128xbf16>
    %48 = vector.shape_cast %47 : vector<16x16x128xbf16> to vector<256x128xbf16>
    %c1_30 = arith.constant 1 : index
    %c1_31 = arith.constant 1 : index
    %c0_32 = arith.constant 0 : index
    %c0_33 = arith.constant 0 : index
    %49 = vector.load %arg3[%c1_30, %c1_31, %c0_32, %c0_33] : memref<3x3x128x128xbf16, #tpu.memory_space<vmem>>, vector<1x1x128x128xbf16>
    %50 = vector.shape_cast %49 : vector<1x1x128x128xbf16> to vector<128x128xbf16>
    %cst_34 = arith.constant dense<0.000000e+00> : vector<256x128xf32>
    %51 = tpu.matmul %48, %50, %cst_34 {dimension_numbers = #tpu.dot_dimension_numbers<[1], [0], [0], [1], [0, 0, 1, 1], [], []>} : vector<256x128xbf16>, vector<128x128xbf16>, vector<256x128xf32> -> vector<256x128xf32>
    %52 = arith.addf %46, %51 : vector<256x128xf32>
    %53 = vector.extract_strided_slice %18 {offsets = [1, 0, 0], sizes = [16, 16, 128], strides = [1, 1, 1]} : vector<18x16x128xbf16> to vector<16x16x128xbf16>
    %54 = vector.shape_cast %53 : vector<16x16x128xbf16> to vector<256x128xbf16>
    %c1_35 = arith.constant 1 : index
    %c2_36 = arith.constant 2 : index
    %c0_37 = arith.constant 0 : index
    %c0_38 = arith.constant 0 : index
    %55 = vector.load %arg3[%c1_35, %c2_36, %c0_37, %c0_38] : memref<3x3x128x128xbf16, #tpu.memory_space<vmem>>, vector<1x1x128x128xbf16>
    %56 = vector.shape_cast %55 : vector<1x1x128x128xbf16> to vector<128x128xbf16>
    %cst_39 = arith.constant dense<0.000000e+00> : vector<256x128xf32>
    %57 = tpu.matmul %54, %56, %cst_39 {dimension_numbers = #tpu.dot_dimension_numbers<[1], [0], [0], [1], [0, 0, 1, 1], [], []>} : vector<256x128xbf16>, vector<128x128xbf16>, vector<256x128xf32> -> vector<256x128xf32>
    %58 = arith.addf %52, %57 : vector<256x128xf32>
    %59 = vector.extract_strided_slice %16 {offsets = [2, 0, 0], sizes = [16, 16, 128], strides = [1, 1, 1]} : vector<18x16x128xbf16> to vector<16x16x128xbf16>
    %60 = vector.shape_cast %59 : vector<16x16x128xbf16> to vector<256x128xbf16>
    %c2_40 = arith.constant 2 : index
    %c0_41 = arith.constant 0 : index
    %c0_42 = arith.constant 0 : index
    %c0_43 = arith.constant 0 : index
    %61 = vector.load %arg3[%c2_40, %c0_41, %c0_42, %c0_43] : memref<3x3x128x128xbf16, #tpu.memory_space<vmem>>, vector<1x1x128x128xbf16>
    %62 = vector.shape_cast %61 : vector<1x1x128x128xbf16> to vector<128x128xbf16>
    %cst_44 = arith.constant dense<0.000000e+00> : vector<256x128xf32>
    %63 = tpu.matmul %60, %62, %cst_44 {dimension_numbers = #tpu.dot_dimension_numbers<[1], [0], [0], [1], [0, 0, 1, 1], [], []>} : vector<256x128xbf16>, vector<128x128xbf16>, vector<256x128xf32> -> vector<256x128xf32>
    %64 = arith.addf %58, %63 : vector<256x128xf32>
    %65 = vector.extract_strided_slice %13 {offsets = [2, 0, 0], sizes = [16, 16, 128], strides = [1, 1, 1]} : vector<18x16x128xbf16> to vector<16x16x128xbf16>
    %66 = vector.shape_cast %65 : vector<16x16x128xbf16> to vector<256x128xbf16>
    %c2_45 = arith.constant 2 : index
    %c1_46 = arith.constant 1 : index
    %c0_47 = arith.constant 0 : index
    %c0_48 = arith.constant 0 : index
    %67 = vector.load %arg3[%c2_45, %c1_46, %c0_47, %c0_48] : memref<3x3x128x128xbf16, #tpu.memory_space<vmem>>, vector<1x1x128x128xbf16>
    %68 = vector.shape_cast %67 : vector<1x1x128x128xbf16> to vector<128x128xbf16>
    %cst_49 = arith.constant dense<0.000000e+00> : vector<256x128xf32>
    %69 = tpu.matmul %66, %68, %cst_49 {dimension_numbers = #tpu.dot_dimension_numbers<[1], [0], [0], [1], [0, 0, 1, 1], [], []>} : vector<256x128xbf16>, vector<128x128xbf16>, vector<256x128xf32> -> vector<256x128xf32>
    %70 = arith.addf %64, %69 : vector<256x128xf32>
    %71 = vector.extract_strided_slice %18 {offsets = [2, 0, 0], sizes = [16, 16, 128], strides = [1, 1, 1]} : vector<18x16x128xbf16> to vector<16x16x128xbf16>
    %72 = vector.shape_cast %71 : vector<16x16x128xbf16> to vector<256x128xbf16>
    %c2_50 = arith.constant 2 : index
    %c2_51 = arith.constant 2 : index
    %c0_52 = arith.constant 0 : index
    %c0_53 = arith.constant 0 : index
    %73 = vector.load %arg3[%c2_50, %c2_51, %c0_52, %c0_53] : memref<3x3x128x128xbf16, #tpu.memory_space<vmem>>, vector<1x1x128x128xbf16>
    %74 = vector.shape_cast %73 : vector<1x1x128x128xbf16> to vector<128x128xbf16>
    %cst_54 = arith.constant dense<0.000000e+00> : vector<256x128xf32>
    %75 = tpu.matmul %72, %74, %cst_54 {dimension_numbers = #tpu.dot_dimension_numbers<[1], [0], [0], [1], [0, 0, 1, 1], [], []>} : vector<256x128xbf16>, vector<128x128xbf16>, vector<256x128xf32> -> vector<256x128xf32>
    %76 = arith.addf %70, %75 : vector<256x128xf32>
    %cst_55 = arith.constant 0.000000e+00 : f32
    %77 = vector.broadcast %cst_55 : f32 to vector<256x128xf32>
    %78 = arith.maximumf %76, %77 : vector<256x128xf32>
    %79 = vector.shape_cast %78 : vector<256x128xf32> to vector<1x16x16x128xf32>
    %c0_56 = arith.constant 0 : index
    %c0_57 = arith.constant 0 : index
    %c0_58 = arith.constant 0 : index
    %c0_59 = arith.constant 0 : index
    %80 = vector.load %arg6[%c0_56, %c0_57, %c0_58, %c0_59] : memref<1x16x16x128xf32, #tpu.memory_space<vmem>>, vector<1x16x16x128xf32>
    tpu.vector_store %arg6[%c0_56, %c0_57, %c0_58, %c0_59], %79 {strides = array<i32>} : memref<1x16x16x128xf32, #tpu.memory_space<vmem>>, vector<1x16x16x128xf32>,
    return
  }
  func.func @transform_0(%arg0: i32) -> (i32, i32, i32, i32) {
    %c0_i32 = arith.constant 0 : i32
    %c0_i32_0 = arith.constant 0 : i32
    %c0_i32_1 = arith.constant 0 : i32
    %c0_i32_2 = arith.constant 0 : i32
    return %arg0, %c0_i32, %c0_i32_0, %c0_i32_1 : i32, i32, i32, i32
  }
  func.func @transform_1(%arg0: i32) -> (i32, i32) {
    %c0_i32 = arith.constant 0 : i32
    %c0_i32_0 = arith.constant 0 : i32
    %c0_i32_1 = arith.constant 0 : i32
    return %c0_i32, %c0_i32_0 : i32, i32
  }
  func.func @transform_2(%arg0: i32) -> (i32, i32, i32, i32) {
    %c0_i32 = arith.constant 0 : i32
    %c0_i32_0 = arith.constant 0 : i32
    %c0_i32_1 = arith.constant 0 : i32
    %c0_i32_2 = arith.constant 0 : i32
    %c0_i32_3 = arith.constant 0 : i32
    return %c0_i32, %c0_i32_0, %c0_i32_1, %c0_i32_2 : i32, i32, i32, i32
  }
  func.func @transform_3(%arg0: i32) -> (i32, i32) {
    %c0_i32 = arith.constant 0 : i32
    %c0_i32_0 = arith.constant 0 : i32
    %c0_i32_1 = arith.constant 0 : i32
    return %c0_i32, %c0_i32_0 : i32, i32
  }
  func.func @transform_4(%arg0: i32) -> (i32, i32) {
    %c0_i32 = arith.constant 0 : i32
    %c0_i32_0 = arith.constant 0 : i32
    %c0_i32_1 = arith.constant 0 : i32
    return %c0_i32, %c0_i32_0 : i32, i32
  }
  func.func @transform_5(%arg0: i32) -> (i32, i32, i32, i32) {
    %c0_i32 = arith.constant 0 : i32
    %c0_i32_0 = arith.constant 0 : i32
    %c0_i32_1 = arith.constant 0 : i32
    %c0_i32_2 = arith.constant 0 : i32
    return %arg0, %c0_i32, %c0_i32_0, %c0_i32_1 : i32, i32, i32, i32
  }
}

</mosaic_0001>

<bundles_post_ra>
// kernel: tpu_custom_call.1
= control target key start
LH: loop header
LB: loop body
LE: loop exit
PB: predicated region body
PF: predicated region fallthrough
CT: control target
= control target key end

     0   :  { %10 = vsyncpa [#allocation3], 0  ;;  %s6056_s0 = inlined_call_operand.hbm [shape: bf16[2,16,16,128], index: 0, kind: input, shape index: {}]   ;;  %s6057_s1 = inlined_call_operand.hbm [shape: bf16[128,128], index: 1, kind: input, shape index: {}]   ;;  %s6058_s2 = inlined_call_operand.hbm [shape: bf16[3,3,128,128], index: 2, kind: input, shape index: {}]   ;;  %s6059_s3 = inlined_call_operand.vmem [shape: f32[1,128], index: 3, kind: input, shape index: {}]   ;;  %s6060_s4 = inlined_call_operand.vmem [shape: f32[1,128], index: 4, kind: input, shape index: {}]   ;;  %s6061_s5 = inlined_call_operand.hbm [shape: f32[2,16,16,128], index: 5, kind: output, shape index: {}]  }
   0x1   :  { %12 = vsyncpa [#allocation3 + $0x1], 0 }
   0x2   :  { %13 = vsyncpa [#allocation6], 0 }
   0x3   :  { %14 = vsyncpa [#allocation4], 0 }
   0x4   :  { %16 = vsyncpa [#allocation4 + $0x1], 0  ;;  %s4697_s18 = smov 0   ;;  %s4699_s19 = smov 0  }
   0x5   :  { %s4701_s20 = smov 0   ;;  %s4703_s21 = smov 0  }
   0x6 LB: > { %s4718_s22 = sadd.s32 4294967295, %s4656_s21   ;;  %s3470_s23 = sadd.s32 4294967294, %s4656_s21   ;;  %s4656_s21 = sphi %s4703_s21, %s6237_s21   ;;  %s4652_s20 = sphi %s4701_s20, %s6236_s20   ;;  %s4648_s19 = sphi %s4699_s19, %s6235_s19   ;;  %s4644_s18 = sphi %s4697_s18, %s6234_s18  }
   0x7   : > { %p42_p0 = scmp.ne.s32.totalorder %s4648_s19, %s4644_s18  ;;  %p6062_p1 = scmp.eq.s32.totalorder %s4718_s22, 0 }
   0x8   : > { %p150_p2 = scmp.eq.s32.totalorder %s4718_s22, 1  ;;  %p156_p3 = scmp.eq.s32.totalorder %s3470_s23, 1 }
   0x9   : > { %p4727_p4 = por %p6062_p1, %p42_p0  ;;  %p3471_p5 = scmp.ge.s32.totalorder %s4656_s21, 1 }
   0xa   : > { %p4732_p6 = por %p156_p3, %p42_p0  ;;  %p163_p7 = scmp.lt.s32.totalorder %s4656_s21, 3 }
   0xb   : > { %s6082_s24 = scalar_select %p4727_p4, 1, 0 }
   0xc   : > { %s6083_s25 = scalar_select %p4732_p6, 1, 0 }
   0xd   : > { %p4737_p8 = pnand %p3471_p5, %p163_p7  ;;  %s4658_s27 = smov [#allocation5]  }
   0xe   : > { %s175_s28 = sshll.u32 %s4658_s27, 4  ;;  %s4659_s30 = smov [#allocation7]   ;;  %s176_s28 = int_to_ptr.vmem [resolvable:$true] %s175_s28 }
   0xf   : > { %s6084_s26 = scalar_select %p4737_p8, 1, 0 }
  0x10   : > { %p4320_p9 = pneg %p4737_p8  ;;  %s188_s6 = sshll.u32 %s4659_s30, 4  ;;  %s189_s6 = int_to_ptr.vmem [resolvable:$true] %s188_s6 }
  0x11   : > { %s4519_s7 = scalar_lea.vmem %s176_s28, 1024  ;;  %p4527_p5 = scmp.lt.s32.totalorder %s176_s28, %s176_s28 }
  0x12   : > { %p4746_p11 = pnand %p4320_p9, %p6062_p1  ;;  %p4520_p13 = scmp.ne.s32.totalorder %s176_s28, %s4519_s7 }
  0x13   : > { %p4528_p7 = scmp.lt.s32.totalorder %s4519_s7, %s4519_s7 }
  0x14   : > { %p4510_p12 = pneg %p4746_p11 }
  0x15   : > { %p4529_p10 = por %p4528_p7, %p4527_p5 }
  0x16   : > { %p4522_p0 = pnand %p4520_p13, %p4510_p12 }
  0x18   : > { %p4523_p3 = pneg %p4522_p0 }
  0x1a   : > { %p4530_p9 = pnand %p4529_p10, %p4523_p3 }
  0x1c   : > { %4533 = shalt.err (!%p4530_p9)
}
  0x1d   : > { %s6063_s8 = smov 64   ;;  %s4661_s9 = smov 4  }
  0x1e   : > { %4323 = dma.hbm_to_vmem [thread:$0]  (!%p4746_p11), %s6057_s1, 1024, %s176_s28, [#allocation6], %s6063_s8, %s6063_s8, %s4661_s9  }
  0x1f   : > { %s4545_s12 = scalar_lea.vmem %s189_s6, 9216  ;;  %p4553_p10 = scmp.lt.s32.totalorder %s189_s6, %s189_s6 }
  0x20   : > { %p4546_p13 = scmp.ne.s32.totalorder %s189_s6, %s4545_s12  ;;  %p4554_p3 = scmp.lt.s32.totalorder %s4545_s12, %s4545_s12 }
  0x22   : > { %p4548_p0 = pnand %p4546_p13, %p4510_p12  ;;  %p4555_p7 = por %p4554_p3, %p4553_p10 }
  0x24   : > { %p4549_p5 = pneg %p4548_p0 }
  0x26   : > { %p4556_p9 = pnand %p4555_p7, %p4549_p5 }
  0x28   : > { %4559 = shalt.err (!%p4556_p9)
}
  0x29   : > { %4326 = dma.hbm_to_vmem [thread:$0]  (!%p4746_p11), %s6058_s2, 9216, %s189_s6, [#allocation6], %s6063_s8, %s6063_s8, %s4661_s9  }
  0x2a   : > { %s4775_s15 = sadd.s32 1, %s4656_s21   ;;  %s29_s16 = sadd.s32 1, %s4652_s20 }
  0x2b   : > { %s26_s17 = ssub.s32 %s4656_s21, %s4775_s15  ;;  %p36_p12 = scmp.ne.s32.totalorder %s4652_s20, %s4648_s19 }
  0x2c   : > { %p27_p13 = scmp.eq.s32.totalorder %s26_s17, 0  ;;  %p37_p0 = scmp.eq.s32.totalorder %s4656_s21, 0 }
  0x2d   : > { %p4785_p5 = por %p150_p2, %p36_p12  ;;  %p4337_p10 = scmp.lt.s32.totalorder %s4656_s21, 2 }
  0x2e   : > { %s4791_s27 = scalar_select %p27_p13, %s4652_s20, %s29_s16  }
  0x2f   : > { %s6086_s23 = scalar_select %p4785_p5, 1, 0 }
  0x30   : > { %p38_p3 = por %p37_p0, %p36_p12  ;;  %s208_s28 = sand.u32 1, %s4652_s20  }
  0x31   : > { %s3475_s29 = sshll.u32 %s208_s28, 7  ;;  %s3586_s30 = sshll.u32 %s4656_s21, 11 }
  0x32   : > { %s4798_s10 = scalar_lea.hbm %s6056_s0, %s3586_s30  ;;  %s212_s11 = scalar_lea.vmem [#allocation2], %s3475_s29 }
  0x33   : > { %s219_s12 = sshll.u32 %s212_s11, 4  ;;  %p4802_p2 = pnand %p4337_p10, %p38_p3  ;;  %s4800_s12 = int_to_ptr.vmem [resolvable:$true] %s219_s12 }
  0x34   : > { %s4806_s14 = scalar_lea.sflag [#allocation3], %s208_s28  ;;  %s4560_s16 = scalar_lea.hbm %s4798_s10, 2048 }
  0x35   : > { %p4561_p11 = scmp.ne.s32.totalorder %s4798_s10, %s4560_s16  ;;  %p4562_p7 = pneg %p4802_p2 }
  0x36   : > { %s4565_s29 = scalar_lea.hbm %s6056_s0, 4096  ;;  %p4566_p13 = scmp.lt.s32.totalorder %s4798_s10, %s6056_s0 }
  0x37   : > { %p4563_p9 = pnand %p4562_p7, %p4561_p11  ;;  %p4567_p0 = scmp.lt.s32.totalorder %s4565_s29, %s4560_s16 }
  0x39   : > { %p4564_p12 = pneg %p4563_p9  ;;  %p4568_p10 = por %p4567_p0, %p4566_p13 }
  0x3b   : > { %p4569_p3 = pnand %p4568_p10, %p4564_p12 }
  0x3d   : > { %4572 = shalt.err (!%p4569_p3)
}
  0x3e   : > { %s4573_s28 = scalar_lea.vmem %s4800_s12, 2048  ;;  %s4662_s11 = smov [#allocation2]  }
  0x3f   : > { %p4574_p1 = scmp.ne.s32.totalorder %s4800_s12, %s4573_s28  ;;  %s4578_s8 = sshll.u32 %s4662_s11, 4  ;;  %s4579_s8 = int_to_ptr.vmem [resolvable:$false] %s4578_s8 }
  0x40   : > { %s4580_s17 = scalar_lea.vmem %s4579_s8, 4096  ;;  %p4581_p9 = scmp.lt.s32.totalorder %s4800_s12, %s4579_s8 }
  0x41   : > { %p4576_p6 = pnand %p4574_p1, %p4562_p7  ;;  %p4582_p5 = scmp.lt.s32.totalorder %s4580_s17, %s4573_s28 }
  0x43   : > { %p4577_p11 = pneg %p4576_p6  ;;  %p4583_p4 = por %p4582_p5, %p4581_p9 }
  0x45   : > { %p4584_p8 = pnand %p4583_p4, %p4577_p11 }
  0x47   : > { %4587 = shalt.err (!%p4584_p8)
}
  0x48   : > { %s6088_s16 = smov 64   ;;  %p6089_p1 = scmp.ne.s32.totalorder %s6084_s26, 0 }
  0x49   : > { %4330 = dma.hbm_to_vmem [thread:$0]  (!%p4802_p2), %s4798_s10, 2048, %s4800_s12, %s4806_s14, %s6088_s16, %s6088_s16, %s4661_s9  }
  0x4a   : > { %231 = sbr.rel (%p6089_p1) target bundleno = 860 (0x35c), region = 40 }
  0x4f   : > { %s4833_s30 = sand.u32 1, %s4648_s19   ;;  %p6090_p4 = scmp.ne.s32.totalorder %s6082_s24, 0 }
  0x50   : > { %s3479_s8 = sshll.u32 %s4833_s30, 7  ;;  %s234_s29 = scalar_lea.sflag [#allocation3], %s4833_s30 }
  0x51   : > { %s4837_s6 = scalar_lea.vmem [#allocation2], %s3479_s8 }
  0x52   : > { %4631 = dma.done.wait (%p6090_p4), %s234_s29, 2048  }
  0x53   : > { %4633 = vsyncadd (%p6090_p4), %s234_s29, 4294965248  ;;  %p6091_p6 = scmp.eq.s32.totalorder %s4718_s22, 0 }
  0x55   : > { %4635 = dma.done.wait (%p6091_p6), [#allocation6], 10240   ;;  %p6092_p8 = pmov %p6091_p6 }
  0x56   : > { %v4380_v0 = vld [vmem:[#allocation5 + $0x38] sm:$0xff]   ;;  %v4381_v1 = vld [vmem:[#allocation5 + $0x30] sm:$0xff]   ;;  %v4382_v2 = vld [vmem:[#allocation5 + $0x28] sm:$0xff]   ;;  %v6076_v39 = vmov 0   ;;  %vm817_vm0 = vcmask 1040384   ;;  %vm888_vm3 = vcmask 1047552  }
  0x57   : > { %4637 = vsyncadd (%p6092_p8), [#allocation6], 4294957056  ;;  %3828 = vmatprep.subr.bf16.mxu0 %v4380_v0  ;;  %v4383_v3 = vld [vmem:[#allocation5 + $0x20] sm:$0xff]   ;;  %v4384_v5 = vld [vmem:[#allocation5 + $0x18] sm:$0xff]   ;;  %vm818_vm1 = vsmask.f32 256 }
  0x58   : > { %3829 = vmatpush3.bf16.msra.mxu0 %v4380_v0  ;;  %v273_v4 = vld [vmem:[%s4837_s6] sm:$0xff]   ;;  %v4385_v6 = vld [vmem:[#allocation5 + $0x10] sm:$0xff]   ;;  %v4406_v7 = vld [vmem:[#allocation7 + $0x38] sm:$0xff]   ;;  %v684_v41 = vrot.slane %v6076_v39, 7  ;;  %vm889_vm4 = vsmask.f32 7424 }
  0x59   : > { %3830 = vmatprep.subr.bf16.mxu0 %v4381_v1  ;;  %3844 = vmatprep.mubr.bf16.mxu0 %v273_v4  ;;  %v4408_v8 = vld [vmem:[#allocation7 + $0x30] sm:$0xff]   ;;  %v4386_v9 = vld [vmem:[#allocation5 + $0x8] sm:$0xff]   ;;  %v4387_v11 = vld [vmem:[#allocation5] sm:$0xff]   ;;  %s3482_s12 = sshll.u32 %s4833_s30, 8  ;;  %s3587_s14 = sshll.u32 %s4718_s22, 12 }
  0x5a   : > { %3876 = vmatprep.subr.bf16.mxu1 %v4406_v7  ;;  %v4410_v10 = vld [vmem:[#allocation7 + $0x28] sm:$0xff]   ;;  %v4412_v12 = vld [vmem:[#allocation7 + $0x20] sm:$0xff]   ;;  %v277_v14 = vld [vmem:[%s4837_s6 + $0x10] sm:$0xff]   ;;  %s5863_s13 = scalar_lea.vmem [#allocation8], %s3482_s12  ;;  %s6009_s17 = scalar_lea.hbm %s6061_s5, %s3587_s14 }
  0x5b   : > { %3877 = vmatpush3.bf16.msra.mxu1 %v4406_v7  ;;  %v275_v13 = vld [vmem:[%s4837_s6 + $0x8] sm:$0xff]   ;;  %v4404_v15 = vld [vmem:[#allocation7 + $0x78] sm:$0xff]   ;;  %v4405_v16 = vld [vmem:[#allocation7 + $0x70] sm:$0xff]   ;;  %s3378_s7 = sshll.u32 %s5863_s13, 4  ;;  %s3365_s16 = scalar_lea.sflag [#allocation4], %s4833_s30  ;;  %s6011_s7 = int_to_ptr.vmem [resolvable:$true] %s3378_s7 }
  0x5c   : > { %3831 = vmatpush3.bf16.msra.mxu0 %v4381_v1  ;;  %3878 = vmatprep.subr.bf16.mxu1 %v4408_v8  ;;  %v279_v17 = vld [vmem:[%s4837_s6 + $0x18] sm:$0xff]   ;;  %v281_v18 = vld [vmem:[%s4837_s6 + $0x20] sm:$0xff]   ;;  %v4407_v19 = vld [vmem:[#allocation7 + $0x68] sm:$0xff]   ;;  %s4588_s22 = scalar_lea.vmem %s6011_s7, 4096  ;;  %p6231_p2 = scmp.ne.s32.totalorder %s6086_s23, 0 }
  0x5d   : > { %3832 = vmatprep.subr.bf16.mxu0 %v4382_v2  ;;  %v4409_v20 = vld [vmem:[#allocation7 + $0x60] sm:$0xff]   ;;  %v283_v21 = vld [vmem:[%s4837_s6 + $0x28] sm:$0xff]   ;;  %v285_v22 = vld [vmem:[%s4837_s6 + $0x30] sm:$0xff]   ;;  %p4589_p5 = scmp.ne.s32.totalorder %s6011_s7, %s4588_s22  ;;  %s4664_s8 = smov [#allocation8]  }
  0x5e   : > { %v4411_v23 = vld [vmem:[#allocation7 + $0x58] sm:$0xff]   ;;  %v289_v25 = vld [vmem:[%s4837_s6 + $0x40] sm:$0xff]   ;;  %v291_v26 = vld [vmem:[%s4837_s6 + $0x48] sm:$0xff]   ;;  %s4592_s29 = sshll.u32 %s4664_s8, 4  ;;  %s4593_s29 = int_to_ptr.vmem [resolvable:$false] %s4592_s29 }
  0x5f   : > { %3879 = vmatpush3.bf16.msra.mxu1 %v4408_v8  ;;  %v287_v24 = vld [vmem:[%s4837_s6 + $0x38] sm:$0xff]   ;;  %v293_v27 = vld [vmem:[%s4837_s6 + $0x50] sm:$0xff]   ;;  %v297_v29 = vld [vmem:[%s4837_s6 + $0x60] sm:$0xff]   ;;  %p4590_p7 = pnand %p4589_p5, %p6231_p2  ;;  %p4595_p13 = scmp.lt.s32.totalorder %s6011_s7, %s4593_s29 }
  0x60   : > { %3833 = vmatpush3.bf16.msra.mxu0 %v4382_v2  ;;  %3880 = vmatprep.subr.bf16.mxu1 %v4410_v10  ;;  %v295_v28 = vld [vmem:[%s4837_s6 + $0x58] sm:$0xff]   ;;  %v299_v30 = vld [vmem:[%s4837_s6 + $0x68] sm:$0xff]   ;;  %v301_v31 = vld [vmem:[%s4837_s6 + $0x70] sm:$0xff]  }
  0x61   : > { %3834 = vmatprep.subr.bf16.mxu0 %v4383_v3  ;;  %v303_v32 = vld [vmem:[%s4837_s6 + $0x78] sm:$0xff]   ;;  %v4413_v33 = vld [vmem:[#allocation7 + $0x50] sm:$0xff]   ;;  %v4415_v35 = vld [vmem:[#allocation7 + $0x48] sm:$0xff]   ;;  %p4591_p12 = pneg %p4590_p7 }
  0x62   : > { %v4414_v34 = vld [vmem:[#allocation7 + $0x18] sm:$0xff]   ;;  %v4416_v36 = vld [vmem:[#allocation7 + $0x10] sm:$0xff]   ;;  %v4417_v37 = vld [vmem:[#allocation7 + $0x40] sm:$0xff]  }
  0x63   : > { %3881 = vmatpush3.bf16.msra.mxu1 %v4410_v10  ;;  %v4418_v38 = vld [vmem:[#allocation7 + $0x8] sm:$0xff]   ;;  %v4419_v40 = vld [vmem:[#allocation7] sm:$0xff]   ;;  %vm4865_vm2 = vmand %vm817_vm0, %vm818_vm1 }
  0x64   : > { %3835 = vmatpush3.bf16.msra.mxu0 %v4383_v3  ;;  %3882 = vmatprep.subr.bf16.mxu1 %v4412_v12  ;;  %v4871_v43 = vsel %vm4865_vm2, 0, %v684_v41  ;;  %v4420_v44 = vld [vmem:[#allocation7 + $0xb8] sm:$0xff]   ;;  %v4877_v47 = vld [vmem:[%s6059_s3] ss:$0 sm:$0xff]  ;;  %v4425_v1 = vld [vmem:[#allocation7 + $0xf0] sm:$0xff]  }
  0x65   : > { %3836 = vmatprep.subr.bf16.mxu0 %v4384_v5  ;;  %3892 = vmatprep.mubr.bf16.mxu1 %v4871_v43  ;;  %v4424_v45 = vld [vmem:[#allocation7 + $0xf8] sm:$0xff]   ;;  %vm5126_vm5 = vmand %vm888_vm3, %vm889_vm4  ;;  %v4459_v42 = vld [vmem:[#allocation7 + $0x1e8] sm:$0xff]  }
  0x67   : > { %3883 = vmatpush3.bf16.msra.mxu1 %v4412_v12 }
  0x68   : > { %3837 = vmatpush3.bf16.msra.mxu0 %v4384_v5  ;;  %3884 = vmatprep.subr.bf16.mxu1 %v4414_v34 }
  0x69   : > { %3838 = vmatprep.subr.bf16.mxu0 %v4385_v6 }
  0x6b   : > { %3885 = vmatpush3.bf16.msra.mxu1 %v4414_v34 }
  0x6c   : > { %3839 = vmatpush3.bf16.msra.mxu0 %v4385_v6  ;;  %3886 = vmatprep.subr.bf16.mxu1 %v4416_v36 }
  0x6d   : > { %3840 = vmatprep.subr.bf16.mxu0 %v4386_v9 }
  0x6f   : > { %3887 = vmatpush3.bf16.msra.mxu1 %v4416_v36 }
  0x70   : > { %3841 = vmatpush3.bf16.msra.mxu0 %v4386_v9  ;;  %3888 = vmatprep.subr.bf16.mxu1 %v4418_v38 }
  0x71   : > { %3842 = vmatprep.subr.bf16.mxu0 %v4387_v11 }
  0x73   : > { %3889 = vmatpush3.bf16.msra.mxu1 %v4418_v38 }
  0x74   : > { %3843 = vmatpush3.bf16.msra.mxu0 %v4387_v11  ;;  %3890 = vmatprep.subr.bf16.mxu1 %v4419_v40 }
  0x75   : > { %3924 = vmatprep.subr.bf16.mxu0 %v4404_v15 }
  0x77   : > { %3845 = vmatmul.mubr.bf16.vlgmr.msra.gmra.mxu0 %v275_v13  ;;  %3891 = vmatpush3.bf16.msra.mxu1 %v4419_v40 }
  0x78   : > { %3848 = vmatprep.mubr.bf16.mxu0 %v277_v14  ;;  %3925 = vmatpush3.bf16.msra.mxu0 %v4404_v15  ;;  %v4427_v14 = vld [vmem:[#allocation7 + $0xe8] sm:$0xff]  }
  0x79   : > { %3926 = vmatprep.subr.bf16.mxu0 %v4405_v16  ;;  %3972 = vmatprep.subr.bf16.mxu1 %v4420_v44 }
  0x7c   : > { %3927 = vmatpush3.bf16.msra.mxu0 %v4405_v16 }
  0x7d   : > { %3928 = vmatprep.subr.bf16.mxu0 %v4407_v19 }
  0x7f   : > { %3849 = vmatmul.mubr.bf16.gmra.mxu0 %v279_v17 }
  0x80   : > { %3852 = vmatprep.mubr.bf16.mxu0 %v281_v18  ;;  %3929 = vmatpush3.bf16.msra.mxu0 %v4407_v19 }
  0x81   : > { %3930 = vmatprep.subr.bf16.mxu0 %v4409_v20 }
  0x84   : > { %3931 = vmatpush3.bf16.msra.mxu0 %v4409_v20 }
  0x85   : > { %3932 = vmatprep.subr.bf16.mxu0 %v4411_v23 }
  0x87   : > { %3853 = vmatmul.mubr.bf16.gmra.mxu0 %v283_v21 }
  0x88   : > { %3856 = vmatprep.mubr.bf16.mxu0 %v285_v22  ;;  %3933 = vmatpush3.bf16.msra.mxu0 %v4411_v23  ;;  %v4421_v23 = vld [vmem:[#allocation7 + $0xb0] sm:$0xff]  }
  0x89   : > { %3934 = vmatprep.subr.bf16.mxu0 %v4413_v33 }
  0x8c   : > { %3935 = vmatpush3.bf16.msra.mxu0 %v4413_v33 }
  0x8d   : > { %3936 = vmatprep.subr.bf16.mxu0 %v4415_v35 }
  0x8f   : > { %3857 = vmatmul.mubr.bf16.gmra.mxu0 %v287_v24 }
  0x90   : > { %3860 = vmatprep.mubr.bf16.mxu0 %v289_v25  ;;  %3937 = vmatpush3.bf16.msra.mxu0 %v4415_v35 }
  0x91   : > { %3938 = vmatprep.subr.bf16.mxu0 %v4417_v37 }
  0x94   : > { %3939 = vmatpush3.bf16.msra.mxu0 %v4417_v37  ;;  %v4422_v37 = vld [vmem:[#allocation7 + $0xa8] sm:$0xff]  }
  0x95   : > { %4020 = vmatprep.subr.bf16.mxu0 %v4424_v45 }
  0x97   : > { %3861 = vmatmul.mubr.bf16.gmra.mxu0 %v291_v26 }
  0x98   : > { %3864 = vmatprep.mubr.bf16.mxu0 %v293_v27 }
  0x9f   : > { %3865 = vmatmul.mubr.bf16.gmra.mxu0 %v295_v28 }
  0xa0   : > { %3868 = vmatprep.mubr.bf16.mxu0 %v297_v29  ;;  %v4428_v29 = vld [vmem:[#allocation7 + $0xe0] sm:$0xff]  }
  0xa7   : > { %3869 = vmatmul.mubr.bf16.gmra.mxu0 %v299_v30 }
  0xa8   : > { %3872 = vmatprep.mubr.bf16.mxu0 %v301_v31 }
  0xaf   : > { %3873 = vmatmul.mubr.bf16.gmra.mxu0 %v303_v32 }
  0xb0   : > { %3940 = vmatprep.mubr.bf16.mxu0 %v6076_v39 }
 0x137   : > { %v3846_v46 = vpop.f32.mrf.mxu0 }
 0x138   : > { %v515_v49 = vadd.f32 %v3846_v46, %v4877_v47 }
 0x139   : > { %v506_v48 = vpop.f32.mrf.mxu0 }
 0x13a   : > { %v507_v51 = vadd.f32 %v4877_v47, %v506_v48  ;;  %v635_v54 = vmax.f32 %v515_v49, 0.0  ;;  %v4430_v48 = vld [vmem:[#allocation7 + $0xd8] sm:$0xff]  }
 0x13b   : > { %v3847_v50 = vpop.f32.mrf.mxu0 }
 0x13c   : > { %v518_v52 = vadd.f32 %v3847_v50, %v4877_v47  ;;  %v633_v58 = vmax.f32 %v507_v51, 0.0 }
 0x13d   : > { %v509_v53 = vpop.f32.mrf.mxu0 }
 0x13e   : > { %v636_v55 = vmax.f32 %v518_v52, 0.0  ;;  %v510_v56 = vadd.f32 %v4877_v47, %v509_v53 }
 0x13f   : > { %v3850_v57 = vpop.f32.mrf.mxu0 }
 0x140   : > { %v4883_v59 = vpack.c.bf16 %v636_v55, %v635_v54  ;;  %v634_v60 = vmax.f32 %v510_v56, 0.0  ;;  %v531_v61 = vadd.f32 %v3850_v57, %v4877_v47  ;;  %v4423_v55 = vld [vmem:[#allocation7 + $0xa0] sm:$0xff]  }
 0x141   : > { %v522_v62 = vpop.f32.mrf.mxu0 }
 0x142   : > { %v4886_v63 = vpack.c.bf16 %v634_v60, %v633_v58  ;;  %v696_v0 = vshrl.u32 %v4883_v59, 16  ;;  %v523_v3 = vadd.f32 %v4877_v47, %v522_v62  ;;  %v639_v6 = vmax.f32 %v531_v61, 0.0  ;;  %v4431_v62 = vld [vmem:[#allocation7 + $0xd0] sm:$0xff]  }
 0x143   : > { %v3851_v2 = vpop.f32.mrf.mxu0  ;;  %v699_v9 = vshll.u32 %v4883_v59, 16 }
 0x144   : > { %v534_v4 = vadd.f32 %v3851_v2, %v4877_v47  ;;  %3941 = vmatmul.mubr.bf16.vlgmr.msra.gmra.mxu0 %v4886_v63  ;;  %v689_v5 = vshrl.u32 %v4886_v63, 16  ;;  %v698_v8 = vrot.slane %v696_v0, 7  ;;  %v692_v13 = vshll.u32 %v4886_v63, 16 }
 0x145   : > { %v525_v7 = vpop.f32.mrf.mxu0  ;;  %3944 = vmatprep.mubr.bf16.mxu0 %v4883_v59  ;;  %4021 = vmatpush3.bf16.msra.mxu0 %v4424_v45  ;;  %v637_v17 = vmax.f32 %v523_v3, 0.0 }
 0x146   : > { %v640_v10 = vmax.f32 %v534_v4, 0.0  ;;  %v526_v11 = vadd.f32 %v4877_v47, %v525_v7  ;;  %v691_v12 = vrot.slane %v689_v5, 7  ;;  %4022 = vmatprep.subr.bf16.mxu0 %v4425_v1  ;;  %v701_v16 = vor.u32 %v699_v9, %v698_v8 }
 0x147   : > { %v3854_v15 = vpop.f32.mrf.mxu0 }
 0x148   : > { %v4903_v18 = vpack.c.bf16 %v640_v10, %v639_v6  ;;  %v638_v19 = vmax.f32 %v526_v11, 0.0  ;;  %v694_v20 = vor.u32 %v692_v13, %v691_v12  ;;  %v547_v21 = vadd.f32 %v3854_v15, %v4877_v47  ;;  %v4426_v10 = vld [vmem:[#allocation7 + $0x98] sm:$0xff]  }
 0x149   : > { %v538_v22 = vpop.f32.mrf.mxu0  ;;  %4023 = vmatpush3.bf16.msra.mxu0 %v4425_v1  ;;  %v4917_v27 = vsel %vm4865_vm2, 0, %v701_v16 }
 0x14a   : > { %v4908_v24 = vpack.c.bf16 %v638_v19, %v637_v17  ;;  %v4912_v25 = vsel %vm4865_vm2, 0, %v694_v20  ;;  %4024 = vmatprep.subr.bf16.mxu0 %v4427_v14  ;;  %v710_v28 = vshrl.u32 %v4903_v18, 16  ;;  %v539_v30 = vadd.f32 %v4877_v47, %v538_v22  ;;  %v4433_v19 = vld [vmem:[#allocation7 + $0xc8] sm:$0xff]  }
 0x14b   : > { %v3855_v26 = vpop.f32.mrf.mxu0  ;;  %3893 = vmatmul.mubr.bf16.vlgmr.msra.gmra.mxu1 %v4912_v25  ;;  %v643_v33 = vmax.f32 %v547_v21, 0.0  ;;  %v713_v36 = vshll.u32 %v4903_v18, 16 }
 0x14c   : > { %v550_v31 = vadd.f32 %v3855_v26, %v4877_v47  ;;  %3973 = vmatpush3.bf16.msra.mxu1 %v4420_v44  ;;  %3896 = vmatprep.mubr.bf16.mxu1 %v4917_v27  ;;  %v703_v32 = vshrl.u32 %v4908_v24, 16  ;;  %v712_v35 = vrot.slane %v710_v28, 7  ;;  %v706_v44 = vshll.u32 %v4908_v24, 16 }
 0x14d   : > { %3945 = vmatmul.mubr.bf16.gmra.mxu0 %v4908_v24  ;;  %v541_v34 = vpop.f32.mrf.mxu0  ;;  %3974 = vmatprep.subr.bf16.mxu1 %v4421_v23  ;;  %v641_v49 = vmax.f32 %v539_v30, 0.0  ;;  %v4429_v30 = vld [vmem:[#allocation7 + $0x90] sm:$0xff]  }
 0x14e   : > { %v644_v38 = vmax.f32 %v550_v31, 0.0  ;;  %v542_v40 = vadd.f32 %v4877_v47, %v541_v34  ;;  %3948 = vmatprep.mubr.bf16.mxu0 %v4903_v18  ;;  %v705_v41 = vrot.slane %v703_v32, 7  ;;  %4025 = vmatpush3.bf16.msra.mxu0 %v4427_v14  ;;  %v715_v46 = vor.u32 %v713_v36, %v712_v35 }
 0x14f   : > { %v3858_v45 = vpop.f32.mrf.mxu0  ;;  %4026 = vmatprep.subr.bf16.mxu0 %v4428_v29 }
 0x150   : > { %v4935_v50 = vpack.c.bf16 %v644_v38, %v643_v33  ;;  %v642_v51 = vmax.f32 %v542_v40, 0.0  ;;  %v708_v52 = vor.u32 %v706_v44, %v705_v41  ;;  %3975 = vmatpush3.bf16.msra.mxu1 %v4421_v23  ;;  %v563_v53 = vadd.f32 %v3858_v45, %v4877_v47  ;;  %v4434_v38 = vld [vmem:[#allocation7 + $0xc0] sm:$0xff]  }
 0x151   : > { %v554_v54 = vpop.f32.mrf.mxu0  ;;  %3976 = vmatprep.subr.bf16.mxu1 %v4422_v37  ;;  %v4949_v60 = vsel %vm4865_vm2, 0, %v715_v46 }
 0x152   : > { %v4940_v56 = vpack.c.bf16 %v642_v51, %v641_v49  ;;  %v4944_v57 = vsel %vm4865_vm2, 0, %v708_v52  ;;  %4027 = vmatpush3.bf16.msra.mxu0 %v4428_v29  ;;  %v724_v61 = vshrl.u32 %v4935_v50, 16  ;;  %v555_v1 = vadd.f32 %v4877_v47, %v554_v54  ;;  %v4432_v52 = vld [vmem:[#allocation7 + $0x88] sm:$0xff]  }
 0x153   : > { %v3859_v58 = vpop.f32.mrf.mxu0  ;;  %3897 = vmatmul.mubr.bf16.gmra.mxu1 %v4944_v57  ;;  %4028 = vmatprep.subr.bf16.mxu0 %v4430_v48  ;;  %v647_v4 = vmax.f32 %v563_v53, 0.0  ;;  %v727_v8 = vshll.u32 %v4935_v50, 16 }
 0x154   : > { %v566_v2 = vadd.f32 %v3859_v58, %v4877_v47  ;;  %3900 = vmatprep.mubr.bf16.mxu1 %v4949_v60  ;;  %v717_v3 = vshrl.u32 %v4940_v56, 16  ;;  %3977 = vmatpush3.bf16.msra.mxu1 %v4422_v37  ;;  %v726_v7 = vrot.slane %v724_v61, 7  ;;  %v720_v15 = vshll.u32 %v4940_v56, 16 }
 0x155   : > { %3949 = vmatmul.mubr.bf16.gmra.mxu0 %v4940_v56  ;;  %v557_v6 = vpop.f32.mrf.mxu0  ;;  %3978 = vmatprep.subr.bf16.mxu1 %v4423_v55  ;;  %v645_v20 = vmax.f32 %v555_v1, 0.0 }
 0x156   : > { %v648_v11 = vmax.f32 %v566_v2, 0.0  ;;  %v558_v12 = vadd.f32 %v4877_v47, %v557_v6  ;;  %3952 = vmatprep.mubr.bf16.mxu0 %v4935_v50  ;;  %v719_v14 = vrot.slane %v717_v3, 7  ;;  %4029 = vmatpush3.bf16.msra.mxu0 %v4430_v48  ;;  %v729_v17 = vor.u32 %v727_v8, %v726_v7  ;;  %v4999_v2 = vld [vmem:[#allocation7 + $0x178] sm:$0xff]  }
 0x157   : > { %v3862_v16 = vpop.f32.mrf.mxu0  ;;  %4030 = vmatprep.subr.bf16.mxu0 %v4431_v62 }
 0x158   : > { %v4967_v21 = vpack.c.bf16 %v648_v11, %v647_v4  ;;  %v646_v22 = vmax.f32 %v558_v12, 0.0  ;;  %v722_v23 = vor.u32 %v720_v15, %v719_v14  ;;  %3979 = vmatpush3.bf16.msra.mxu1 %v4423_v55  ;;  %v579_v26 = vadd.f32 %v3862_v16, %v4877_v47  ;;  %v4435_v14 = vld [vmem:[#allocation7 + $0x80] sm:$0xff]  }
 0x159   : > { %v570_v29 = vpop.f32.mrf.mxu0  ;;  %3980 = vmatprep.subr.bf16.mxu1 %v4426_v10  ;;  %v4981_v35 = vsel %vm4865_vm2, 0, %v729_v17 }
 0x15a   : > { %v4972_v31 = vpack.c.bf16 %v646_v22, %v645_v20  ;;  %v4976_v33 = vsel %vm4865_vm2, 0, %v722_v23  ;;  %4031 = vmatpush3.bf16.msra.mxu0 %v4431_v62  ;;  %v738_v37 = vshrl.u32 %v4967_v21, 16  ;;  %v571_v40 = vadd.f32 %v4877_v47, %v570_v29 }
 0x15b   : > { %v3863_v34 = vpop.f32.mrf.mxu0  ;;  %3901 = vmatmul.mubr.bf16.gmra.mxu1 %v4976_v33  ;;  %4032 = vmatprep.subr.bf16.mxu0 %v4433_v19  ;;  %v651_v46 = vmax.f32 %v579_v26, 0.0  ;;  %v741_v51 = vshll.u32 %v4967_v21, 16 }
 0x15c   : > { %v582_v41 = vadd.f32 %v3863_v34, %v4877_v47  ;;  %3904 = vmatprep.mubr.bf16.mxu1 %v4981_v35  ;;  %v731_v45 = vshrl.u32 %v4972_v31, 16  ;;  %3981 = vmatpush3.bf16.msra.mxu1 %v4426_v10  ;;  %v740_v49 = vrot.slane %v738_v37, 7  ;;  %v734_v58 = vshll.u32 %v4972_v31, 16 }
 0x15d   : > { %3953 = vmatmul.mubr.bf16.gmra.mxu0 %v4972_v31  ;;  %v573_v48 = vpop.f32.mrf.mxu0  ;;  %3982 = vmatprep.subr.bf16.mxu1 %v4429_v30  ;;  %v649_v4 = vmax.f32 %v571_v40, 0.0 }
 0x15e   : > { %v652_v53 = vmax.f32 %v582_v41, 0.0  ;;  %v574_v54 = vadd.f32 %v4877_v47, %v573_v48  ;;  %3956 = vmatprep.mubr.bf16.mxu0 %v4967_v21  ;;  %v733_v55 = vrot.slane %v731_v45, 7  ;;  %4033 = vmatpush3.bf16.msra.mxu0 %v4433_v19  ;;  %v743_v1 = vor.u32 %v741_v51, %v740_v49  ;;  %v5027_v41 = vld [vmem:[#allocation7 + $0x138] sm:$0xff]  }
 0x15f   : > { %v3866_v62 = vpop.f32.mrf.mxu0  ;;  %4034 = vmatprep.subr.bf16.mxu0 %v4434_v38 }
 0x160   : > { %v5001_v6 = vpack.c.bf16 %v652_v53, %v651_v46  ;;  %v650_v7 = vmax.f32 %v574_v54, 0.0  ;;  %v736_v10 = vor.u32 %v734_v58, %v733_v55  ;;  %3983 = vmatpush3.bf16.msra.mxu1 %v4429_v30  ;;  %v595_v11 = vadd.f32 %v3866_v62, %v4877_v47 }
 0x161   : > { %v586_v12 = vpop.f32.mrf.mxu0  ;;  %3984 = vmatprep.subr.bf16.mxu1 %v4432_v52  ;;  %v5015_v20 = vsel %vm4865_vm2, 0, %v743_v1 }
 0x162   : > { %v5006_v16 = vpack.c.bf16 %v650_v7, %v649_v4  ;;  %v5010_v17 = vsel %vm4865_vm2, 0, %v736_v10  ;;  %4035 = vmatpush3.bf16.msra.mxu0 %v4434_v38  ;;  %v6068_v22 = vshrl.u32 %v5001_v6, 16  ;;  %v587_v23 = vadd.f32 %v4877_v47, %v586_v12 }
 0x163   : > { %v3867_v19 = vpop.f32.mrf.mxu0  ;;  %3905 = vmatmul.mubr.bf16.gmra.mxu1 %v5010_v17  ;;  %4116 = vmatprep.subr.bf16.mxu0 %v4999_v2  ;;  %v655_v30 = vmax.f32 %v595_v11, 0.0  ;;  %v6073_v40 = vshll.u32 %v5001_v6, 16 }
 0x164   : > { %v598_v26 = vadd.f32 %v3867_v19, %v4877_v47  ;;  %3908 = vmatprep.mubr.bf16.mxu1 %v5015_v20  ;;  %v6069_v29 = vshrl.u32 %v5006_v16, 16  ;;  %3985 = vmatpush3.bf16.msra.mxu1 %v4432_v52  ;;  %v754_v38 = vrot.slane %v6068_v22, 7  ;;  %v6074_v52 = vshll.u32 %v5006_v16, 16 }
 0x165   : > { %3957 = vmatmul.mubr.bf16.gmra.mxu0 %v5006_v16  ;;  %v589_v34 = vpop.f32.mrf.mxu0  ;;  %3986 = vmatprep.subr.bf16.mxu1 %v4435_v14  ;;  %v653_v55 = vmax.f32 %v587_v23, 0.0 }
 0x166   : > { %v656_v46 = vmax.f32 %v598_v26, 0.0  ;;  %v590_v48 = vadd.f32 %v4877_v47, %v589_v34  ;;  %3960 = vmatprep.mubr.bf16.mxu0 %v5001_v6  ;;  %v747_v49 = vrot.slane %v6069_v29, 7  ;;  %v757_v54 = vor.u32 %v6073_v40, %v754_v38 }
 0x167   : > { %v3870_v53 = vpop.f32.mrf.mxu0 }
 0x168   : > { %v5036_v62 = vpack.c.bf16 %v656_v46, %v655_v30  ;;  %v654_v1 = vmax.f32 %v590_v48, 0.0  ;;  %v750_v4 = vor.u32 %v6074_v52, %v747_v49  ;;  %3987 = vmatpush3.bf16.msra.mxu1 %v4435_v14  ;;  %v611_v7 = vadd.f32 %v3870_v53, %v4877_v47 }
 0x169   : > { %v602_v10 = vpop.f32.mrf.mxu0  ;;  %4068 = vmatprep.subr.bf16.mxu1 %v5027_v41  ;;  %v5052_v26 = vsel %vm4865_vm2, 0, %v757_v54 }
 0x16a   : > { %v5042_v11 = vpack.c.bf16 %v654_v1, %v653_v55  ;;  %v5046_v12 = vsel %vm4865_vm2, 0, %v750_v4  ;;  %v603_v19 = vadd.f32 %v4877_v47, %v602_v10  ;;  %v6067_v14 = vshrl.u32 %v5036_v62, 16 }
 0x16b   : > { %v3871_v23 = vpop.f32.mrf.mxu0  ;;  %3909 = vmatmul.mubr.bf16.gmra.mxu1 %v5046_v12  ;;  %v659_v38 = vmax.f32 %v611_v7, 0.0  ;;  %v6071_v49 = vshll.u32 %v5036_v62, 16 }
 0x16c   : > { %v614_v30 = vadd.f32 %v3871_v23, %v4877_v47  ;;  %3912 = vmatprep.mubr.bf16.mxu1 %v5052_v26  ;;  %v6070_v34 = vshrl.u32 %v5042_v11, 16  ;;  %v768_v48 = vrot.slane %v6067_v14, 7  ;;  %v6072_v1 = vshll.u32 %v5042_v11, 16 }
 0x16d   : > { %3961 = vmatmul.mubr.bf16.gmra.mxu0 %v5042_v11  ;;  %v605_v46 = vpop.f32.mrf.mxu0  ;;  %v657_v4 = vmax.f32 %v603_v19, 0.0 }
 0x16e   : > { %v660_v53 = vmax.f32 %v614_v30, 0.0  ;;  %v606_v54 = vadd.f32 %v4877_v47, %v605_v46  ;;  %3964 = vmatprep.mubr.bf16.mxu0 %v5036_v62  ;;  %v761_v55 = vrot.slane %v6070_v34, 7  ;;  %v771_v10 = vor.u32 %v6071_v49, %v768_v48 }
 0x16f   : > { %v3874_v7 = vpop.f32.mrf.mxu0 }
 0x170   : > { %v5069_v23 = vpack.c.bf16 %v660_v53, %v659_v38  ;;  %v658_v14 = vmax.f32 %v606_v54, 0.0  ;;  %v627_v22 = vadd.f32 %v3874_v7, %v4877_v47  ;;  %v764_v30 = vor.u32 %v6072_v1, %v761_v55 }
 0x171   : > { %v618_v46 = vpop.f32.mrf.mxu0  ;;  %v5083_v38 = vsel %vm4865_vm2, 0, %v771_v10 }
 0x172   : > { %v5074_v29 = vpack.c.bf16 %v658_v14, %v657_v4  ;;  %v5078_v34 = vsel %vm4865_vm2, 0, %v764_v30  ;;  %v6075_v48 = vshrl.u32 %v5069_v23, 16  ;;  %v619_v53 = vadd.f32 %v4877_v47, %v618_v46 }
 0x173   : > { %v3875_v19 = vpop.f32.mrf.mxu0  ;;  %3913 = vmatmul.mubr.bf16.gmra.mxu1 %v5078_v34  ;;  %v663_v55 = vmax.f32 %v627_v22, 0.0  ;;  %v783_v10 = vshll.u32 %v5069_v23, 16 }
 0x174   : > { %v630_v54 = vadd.f32 %v3875_v19, %v4877_v47  ;;  %3916 = vmatprep.mubr.bf16.mxu1 %v5083_v38  ;;  %v773_v14 = vshrl.u32 %v5074_v29, 16  ;;  %v782_v7 = vrot.slane %v6075_v48, 7  ;;  %v776_v19 = vshll.u32 %v5074_v29, 16 }
 0x175   : > { %3965 = vmatmul.mubr.bf16.gmra.mxu0 %v5074_v29  ;;  %v621_v4 = vpop.f32.mrf.mxu0  ;;  %v661_v1 = vmax.f32 %v619_v53, 0.0 }
 0x176   : > { %v664_v30 = vmax.f32 %v630_v54, 0.0  ;;  %v622_v49 = vadd.f32 %v4877_v47, %v621_v4  ;;  %3968 = vmatprep.mubr.bf16.mxu0 %v5069_v23  ;;  %v775_v46 = vrot.slane %v773_v14, 7  ;;  %v785_v22 = vor.u32 %v783_v10, %v782_v7 }
 0x178   : > { %v5101_v40 = vpack.c.bf16 %v664_v30, %v663_v55  ;;  %v662_v52 = vmax.f32 %v622_v49, 0.0  ;;  %v778_v48 = vor.u32 %v776_v19, %v775_v46  ;;  %v5114_v4 = vsel %vm4865_vm2, 0, %v785_v22  ;;  %v4441_v22 = vld [vmem:[#allocation7 + $0x170] sm:$0xff]   ;;  %v4493_v55 = vld [vmem:[%s4837_s6] sm:$0xff]  }
 0x179   : > { %v837_v49 = vrot.slane %v6076_v39, 1  ;;  %v839_v30 = vrot.slane %v692_v13, 1  ;;  %v841_v46 = vrot.slane %v699_v9, 1  ;;  %v843_v39 = vrot.slane %v706_v44, 1  ;;  %v4438_v44 = vld [vmem:[#allocation7 + $0x128] sm:$0xff]  }
 0x17a   : > { %v5105_v54 = vpack.c.bf16 %v662_v52, %v661_v1  ;;  %v5109_v47 = vsel %vm4865_vm2, 0, %v778_v48 }
 0x17b   : > { %3917 = vmatmul.mubr.bf16.gmra.mxu1 %v5109_v47  ;;  %v5132_v7 = vsel %vm5126_vm5, %v837_v49, 0  ;;  %v840_v49 = vor.u32 %v839_v30, %v689_v5  ;;  %v842_v13 = vor.u32 %v841_v46, %v696_v0  ;;  %v845_v0 = vrot.slane %v713_v36, 1  ;;  %v4446_v36 = vld [vmem:[#allocation7 + $0x158] sm:$0xff]  }
 0x17c   : > { %3920 = vmatprep.mubr.bf16.mxu1 %v5114_v4  ;;  %v787_v53 = vshrl.u32 %v5105_v54, 16  ;;  %v790_v1 = vshll.u32 %v5105_v54, 16  ;;  %6097 = vst [vmem:[#allocation12_spill] sm:$0xff] %v5132_v7  ;;  %v844_v30 = vor.u32 %v843_v39, %v703_v32  ;;  %v4447_v32 = vld [vmem:[#allocation7 + $0x150] sm:$0xff]  }
 0x17d   : > { %3969 = vmatmul.mubr.bf16.gmra.mxu0 %v5105_v54  ;;  %v5153_v9 = vsel %vm5126_vm5, %v840_v49, 0  ;;  %v5160_v5 = vsel %vm5126_vm5, %v842_v13, 0  ;;  %v846_v46 = vor.u32 %v845_v0, %v710_v28  ;;  %v847_v49 = vrot.slane %v720_v15, 1  ;;  %v4442_v13 = vld [vmem:[#allocation7 + $0x118] sm:$0xff]  }
 0x17e   : > { %4036 = vmatprep.mubr.bf16.mxu0 %v4912_v25  ;;  %v789_v52 = vrot.slane %v787_v53, 7  ;;  %v849_v28 = vrot.slane %v727_v8, 1  ;;  %v4449_v8 = vld [vmem:[#allocation7 + $0x148] sm:$0xff]  }
 0x17f   : > { %v5181_v39 = vsel %vm5126_vm5, %v846_v46, 0  ;;  %v848_v15 = vor.u32 %v847_v49, %v717_v3  ;;  %v6098_v49 = vshll.u32 %v5006_v16, 16 }
 0x180   : > { %v792_v48 = vor.u32 %v790_v1, %v789_v52  ;;  %v4443_v52 = vld [vmem:[#allocation7 + $0x168] sm:$0xff]  }
 0x181   : > { %v5194_v0 = vsel %vm5126_vm5, %v848_v15, 0  ;;  %v6100_v15 = vshrl.u32 %v5006_v16, 16 }
 0x182   : > { %v5138_v25 = vsel %vm4865_vm2, 0, %v792_v48  ;;  %v4437_v48 = vld [vmem:[#allocation7 + $0x130] sm:$0xff]  }
 0x183   : > { %3921 = vmatmul.mubr.bf16.gmra.mxu1 %v5138_v25 }
 0x184   : > { %3988 = vmatprep.mubr.bf16.mxu1 %v5132_v7 }
 0x185   : > { %4037 = vmatmul.mubr.bf16.vlgmr.msra.gmra.mxu0 %v4917_v27 }
 0x186   : > { %4040 = vmatprep.mubr.bf16.mxu0 %v4944_v57  ;;  %4117 = vmatpush3.bf16.msra.mxu0 %v4999_v2  ;;  %v4444_v2 = vld [vmem:[#allocation7 + $0x160] sm:$0xff]  }
 0x187   : > { %4118 = vmatprep.subr.bf16.mxu0 %v4441_v22 }
 0x18a   : > { %4119 = vmatpush3.bf16.msra.mxu0 %v4441_v22  ;;  %v5174_v22 = vsel %vm5126_vm5, %v844_v30, 0  ;;  %v4448_v30 = vld [vmem:[#allocation7 + $0x108] sm:$0xff]  }
 0x18b   : > { %3989 = vmatmul.mubr.bf16.vlgmr.msra.gmra.mxu1 %v5153_v9  ;;  %4120 = vmatprep.subr.bf16.mxu0 %v4443_v52 }
 0x18c   : > { %4069 = vmatpush3.bf16.msra.mxu1 %v5027_v41  ;;  %3992 = vmatprep.mubr.bf16.mxu1 %v5160_v5  ;;  %v4439_v41 = vld [vmem:[#allocation7 + $0x120] sm:$0xff]  }
 0x18d   : > { %4041 = vmatmul.mubr.bf16.gmra.mxu0 %v4949_v60  ;;  %4070 = vmatprep.subr.bf16.mxu1 %v4437_v48 }
 0x18e   : > { %4044 = vmatprep.mubr.bf16.mxu0 %v4976_v33  ;;  %4121 = vmatpush3.bf16.msra.mxu0 %v4443_v52  ;;  %v850_v52 = vor.u32 %v849_v28, %v724_v61  ;;  %v853_v61 = vrot.slane %v741_v51, 1  ;;  %v4456_v51 = vld [vmem:[#allocation7 + $0x1f8] sm:$0xff]   ;;  %v855_v28 = vrot.slane %v6098_v49, 1 }
 0x18f   : > { %4122 = vmatprep.subr.bf16.mxu0 %v4444_v2 }
 0x190   : > { %4071 = vmatpush3.bf16.msra.mxu1 %v4437_v48  ;;  %v4445_v48 = vld [vmem:[#allocation7 + $0x110] sm:$0xff]   ;;  %v5201_v3 = vsel %vm5126_vm5, %v850_v52, 0  ;;  %v854_v46 = vor.u32 %v853_v61, %v738_v37  ;;  %v6099_v37 = vshll.u32 %v5001_v6, 16  ;;  %v856_v52 = vor.u32 %v855_v28, %v6100_v15 }
 0x191   : > { %4072 = vmatprep.subr.bf16.mxu1 %v4438_v44  ;;  %v6102_v61 = vshll.u32 %v5042_v11, 16  ;;  %v6105_v28 = vshrl.u32 %v5036_v62, 16 }
 0x192   : > { %4123 = vmatpush3.bf16.msra.mxu0 %v4444_v2  ;;  %v851_v2 = vrot.slane %v734_v58, 1 }
 0x193   : > { %3993 = vmatmul.mubr.bf16.gmra.mxu1 %v5174_v22  ;;  %4124 = vmatprep.subr.bf16.mxu0 %v4446_v36 }
 0x194   : > { %3996 = vmatprep.mubr.bf16.mxu1 %v5181_v39  ;;  %4073 = vmatpush3.bf16.msra.mxu1 %v4438_v44  ;;  %v4450_v44 = vld [vmem:[#allocation7 + $0x140] sm:$0xff]   ;;  %v852_v58 = vor.u32 %v851_v2, %v731_v45  ;;  %v5221_v45 = vsel %vm5126_vm5, %v854_v46, 0  ;;  %v5234_v2 = vsel %vm5126_vm5, %v856_v52, 0  ;;  %v863_v52 = vrot.slane %v776_v19, 1 }
 0x195   : > { %4045 = vmatmul.mubr.bf16.gmra.mxu0 %v4981_v35  ;;  %4074 = vmatprep.subr.bf16.mxu1 %v4439_v41 }
 0x196   : > { %4048 = vmatprep.mubr.bf16.mxu0 %v5010_v17  ;;  %4125 = vmatpush3.bf16.msra.mxu0 %v4446_v36  ;;  %v4451_v36 = vld [vmem:[#allocation7 + $0x100] sm:$0xff]   ;;  %v864_v19 = vor.u32 %v863_v52, %v773_v14  ;;  %v4457_v52 = vld [vmem:[#allocation7 + $0x1f0] sm:$0xff]  }
 0x197   : > { %4126 = vmatprep.subr.bf16.mxu0 %v4447_v32 }
 0x198   : > { %4075 = vmatpush3.bf16.msra.mxu1 %v4439_v41  ;;  %v5214_v41 = vsel %vm5126_vm5, %v852_v58, 0  ;;  %v6103_v58 = vshll.u32 %v5036_v62, 16 }
 0x199   : > { %4076 = vmatprep.subr.bf16.mxu1 %v4442_v13 }
 0x19a   : > { %4127 = vmatpush3.bf16.msra.mxu0 %v4447_v32  ;;  %v857_v32 = vrot.slane %v6099_v37, 1  ;;  %v861_v46 = vrot.slane %v6103_v58, 1  ;;  %v6106_v58 = vshrl.u32 %v5069_v23, 16 }
 0x19b   : > { %3997 = vmatmul.mubr.bf16.gmra.mxu1 %v5194_v0  ;;  %4128 = vmatprep.subr.bf16.mxu0 %v4449_v8 }
 0x19c   : > { %4000 = vmatprep.mubr.bf16.mxu1 %v5201_v3  ;;  %4077 = vmatpush3.bf16.msra.mxu1 %v4442_v13  ;;  %v4452_v13 = vld [vmem:[#allocation7 + $0x1b8] sm:$0xff]   ;;  %v862_v37 = vor.u32 %v861_v46, %v6105_v28 }
 0x19d   : > { %4049 = vmatmul.mubr.bf16.gmra.mxu0 %v5015_v20  ;;  %4078 = vmatprep.subr.bf16.mxu1 %v4445_v48 }
 0x19e   : > { %4052 = vmatprep.mubr.bf16.mxu0 %v5046_v12  ;;  %4129 = vmatpush3.bf16.msra.mxu0 %v4449_v8  ;;  %v6101_v8 = vshrl.u32 %v5001_v6, 16 }
 0x19f   : > { %4130 = vmatprep.subr.bf16.mxu0 %v4450_v44 }
 0x1a0   : > { %4079 = vmatpush3.bf16.msra.mxu1 %v4445_v48  ;;  %v858_v48 = vor.u32 %v857_v32, %v6101_v8  ;;  %v794_v32 = vshrl.u32 %v5101_v40, 16  ;;  %v5262_v8 = vsel %vm5126_vm5, %v862_v37, 0 }
 0x1a1   : > { %4080 = vmatprep.subr.bf16.mxu1 %v4448_v30 }
 0x1a2   : > { %4131 = vmatpush3.bf16.msra.mxu0 %v4450_v44  ;;  %v859_v44 = vrot.slane %v6102_v61, 1  ;;  %v796_v61 = vrot.slane %v794_v32, 7 }
 0x1a3   : > { %4001 = vmatmul.mubr.bf16.gmra.mxu1 %v5214_v41  ;;  %4212 = vmatprep.subr.bf16.mxu0 %v4456_v51 }
 0x1a4   : > { %4004 = vmatprep.mubr.bf16.mxu1 %v5221_v45  ;;  %4081 = vmatpush3.bf16.msra.mxu1 %v4448_v30  ;;  %v5241_v30 = vsel %vm5126_vm5, %v858_v48, 0  ;;  %v865_v48 = vrot.slane %v783_v10, 1 }
 0x1a5   : > { %4053 = vmatmul.mubr.bf16.gmra.mxu0 %v5052_v26  ;;  %4082 = vmatprep.subr.bf16.mxu1 %v4451_v36 }
 0x1a6   : > { %4056 = vmatprep.mubr.bf16.mxu0 %v5078_v34  ;;  %v866_v46 = vor.u32 %v865_v48, %v6106_v58  ;;  %v4455_v48 = vld [vmem:[#allocation7 + $0x1a0] sm:$0xff]   ;;  %v4461_v58 = vld [vmem:[#allocation7 + $0x190] sm:$0xff]  }
 0x1a8   : > { %4083 = vmatpush3.bf16.msra.mxu1 %v4451_v36  ;;  %v6104_v36 = vshrl.u32 %v5042_v11, 16  ;;  %v5287_v14 = vsel %vm5126_vm5, %v866_v46, 0  ;;  %v4466_v46 = vld [vmem:[#allocation7 + $0x1c0] sm:$0xff]  }
 0x1a9   : > { %4164 = vmatprep.subr.bf16.mxu1 %v4452_v13  ;;  %6108 = vst [vmem:[#allocation14_spill] sm:$0xff] %v5287_v14 }
 0x1aa   : > { %v860_v49 = vor.u32 %v859_v44, %v6104_v36  ;;  %v797_v44 = vshll.u32 %v5101_v40, 16  ;;  %v5280_v36 = vsel %vm5126_vm5, %v864_v19, 0  ;;  %v4465_v19 = vld [vmem:[#allocation7 + $0x1c8] sm:$0xff]  }
 0x1ab   : > { %4005 = vmatmul.mubr.bf16.gmra.mxu1 %v5234_v2  ;;  %6107 = vst [vmem:[#allocation13_spill] sm:$0xff] %v5280_v36 }
 0x1ac   : > { %4008 = vmatprep.mubr.bf16.mxu1 %v5241_v30  ;;  %v5255_v15 = vsel %vm5126_vm5, %v860_v49, 0  ;;  %v799_v10 = vor.u32 %v797_v44, %v796_v61  ;;  %v867_v49 = vrot.slane %v790_v1, 1  ;;  %v4463_v61 = vld [vmem:[#allocation7 + $0x1d0] sm:$0xff]  }
 0x1ad   : > { %4057 = vmatmul.mubr.bf16.gmra.mxu0 %v5083_v38 }
 0x1ae   : > { %4060 = vmatprep.mubr.bf16.mxu0 %v5109_v47  ;;  %v5292_v28 = vsel %vm4865_vm2, 0, %v799_v10  ;;  %v868_v37 = vor.u32 %v867_v49, %v787_v53  ;;  %v4460_v53 = vld [vmem:[#allocation7 + $0x1e0] sm:$0xff]   ;;  %v4464_v10 = vld [vmem:[#allocation7 + $0x188] sm:$0xff]  }
 0x1af   : > { %v4467_v49 = vld [vmem:[#allocation7 + $0x180] sm:$0xff]  }
 0x1b0   : > { %v5300_v1 = vsel %vm5126_vm5, %v868_v37, 0  ;;  %v4468_v37 = vld [vmem:[#allocation7 + $0x238] sm:$0xff]  }
 0x1b1   : > { %6109 = vst [vmem:[#allocation15_spill] sm:$0xff] %v5300_v1 }
 0x1b3   : > { %4009 = vmatmul.mubr.bf16.gmra.mxu1 %v5255_v15 }
 0x1b4   : > { %4012 = vmatprep.mubr.bf16.mxu1 %v5262_v8 }
 0x1b5   : > { %4061 = vmatmul.mubr.bf16.gmra.mxu0 %v5114_v4 }
 0x1b6   : > { %4064 = vmatprep.mubr.bf16.mxu0 %v5138_v25 }
 0x1bb   : > { %4013 = vmatmul.mubr.bf16.gmra.mxu1 %v5280_v36 }
 0x1bc   : > { %4016 = vmatprep.mubr.bf16.mxu1 %v5287_v14 }
 0x1bd   : > { %4065 = vmatmul.mubr.bf16.gmra.mxu0 %v5292_v28 }
 0x1be   : > { %4132 = vmatprep.mubr.bf16.mxu0 %v5153_v9  ;;  %v4453_v9 = vld [vmem:[#allocation7 + $0x1b0] sm:$0xff]  }
 0x1c3   : > { %4017 = vmatmul.mubr.bf16.gmra.mxu1 %v5300_v1 }
 0x1c4   : > { %4084 = vmatprep.mubr.bf16.mxu1 %v4886_v63  ;;  %v4454_v63 = vld [vmem:[#allocation7 + $0x1a8] sm:$0xff]  }
 0x1c5   : > { %4133 = vmatmul.mubr.bf16.vlgmr.msra.gmra.mxu0 %v5160_v5 }
 0x1c6   : > { %4136 = vmatprep.mubr.bf16.mxu0 %v5174_v22  ;;  %4213 = vmatpush3.bf16.msra.mxu0 %v4456_v51  ;;  %v4462_v51 = vld [vmem:[#allocation7 + $0x1d8] sm:$0xff]  }
 0x1c7   : > { %4214 = vmatprep.subr.bf16.mxu0 %v4457_v52 }
 0x1ca   : > { %4215 = vmatpush3.bf16.msra.mxu0 %v4457_v52  ;;  %v869_v52 = vrot.slane %v797_v44, 1 }
 0x1cb   : > { %4085 = vmatmul.mubr.bf16.vlgmr.msra.gmra.mxu1 %v4883_v59  ;;  %4216 = vmatprep.subr.bf16.mxu0 %v4459_v42 }
 0x1cc   : > { %4165 = vmatpush3.bf16.msra.mxu1 %v4452_v13  ;;  %4088 = vmatprep.mubr.bf16.mxu1 %v4908_v24  ;;  %v4458_v13 = vld [vmem:[#allocation7 + $0x198] sm:$0xff]  }
 0x1cd   : > { %4137 = vmatmul.mubr.bf16.gmra.mxu0 %v5181_v39  ;;  %4166 = vmatprep.subr.bf16.mxu1 %v4453_v9 }
 0x1ce   : > { %4140 = vmatprep.mubr.bf16.mxu0 %v5194_v0  ;;  %4217 = vmatpush3.bf16.msra.mxu0 %v4459_v42  ;;  %v870_v42 = vor.u32 %v869_v52, %v794_v32  ;;  %v5349_v32 = vld [vmem:[%s6060_s4] ss:$0 sm:$0xff] }
 0x1cf   : > { %4218 = vmatprep.subr.bf16.mxu0 %v4460_v53 }
 0x1d0   : > { %4167 = vmatpush3.bf16.msra.mxu1 %v4453_v9  ;;  %v5338_v9 = vsel %vm5126_vm5, %v870_v42, 0 }
 0x1d1   : > { %4168 = vmatprep.subr.bf16.mxu1 %v4454_v63  ;;  %6110 = vst [vmem:[#allocation16_spill] sm:$0xff] %v5338_v9 }
 0x1d2   : > { %4219 = vmatpush3.bf16.msra.mxu0 %v4460_v53  ;;  %v4492_v53 = vld [vmem:[%s4837_s6 + $0x8] sm:$0xff]  }
 0x1d3   : > { %4089 = vmatmul.mubr.bf16.gmra.mxu1 %v4903_v18  ;;  %4220 = vmatprep.subr.bf16.mxu0 %v4462_v51 }
 0x1d4   : > { %4092 = vmatprep.mubr.bf16.mxu1 %v4940_v56  ;;  %4169 = vmatpush3.bf16.msra.mxu1 %v4454_v63  ;;  %v910_v63 = vunpack.c.l.bf16 %v4492_v53 }
 0x1d5   : > { %4141 = vmatmul.mubr.bf16.gmra.mxu0 %v5201_v3  ;;  %4170 = vmatprep.subr.bf16.mxu1 %v4455_v48 }
 0x1d6   : > { %4144 = vmatprep.mubr.bf16.mxu0 %v5214_v41  ;;  %4221 = vmatpush3.bf16.msra.mxu0 %v4462_v51  ;;  %v908_v51 = vunpack.c.l.bf16 %v4493_v55 }
 0x1d7   : > { %4222 = vmatprep.subr.bf16.mxu0 %v4463_v61 }
 0x1d8   : > { %4171 = vmatpush3.bf16.msra.mxu1 %v4455_v48 }
 0x1d9   : > { %4172 = vmatprep.subr.bf16.mxu1 %v4458_v13 }
 0x1da   : > { %4223 = vmatpush3.bf16.msra.mxu0 %v4463_v61  ;;  %v949_v61 = vadd.f32 %v5349_v32, %v910_v63  ;;  %v4470_v63 = vld [vmem:[#allocation7 + $0x228] sm:$0xff]  }
 0x1db   : > { %4093 = vmatmul.mubr.bf16.gmra.mxu1 %v4935_v50  ;;  %4224 = vmatprep.subr.bf16.mxu0 %v4465_v19 }
 0x1dc   : > { %4096 = vmatprep.mubr.bf16.mxu1 %v4972_v31  ;;  %4173 = vmatpush3.bf16.msra.mxu1 %v4458_v13  ;;  %v911_v13 = vunpack.c.h.bf16 %v4492_v53 }
 0x1dd   : > { %4145 = vmatmul.mubr.bf16.gmra.mxu0 %v5221_v45  ;;  %4174 = vmatprep.subr.bf16.mxu1 %v4461_v58 }
 0x1de   : > { %4148 = vmatprep.mubr.bf16.mxu0 %v5234_v2  ;;  %4225 = vmatpush3.bf16.msra.mxu0 %v4465_v19  ;;  %v909_v19 = vunpack.c.h.bf16 %v4493_v55 }
 0x1df   : > { %4226 = vmatprep.subr.bf16.mxu0 %v4466_v46 }
 0x1e0   : > { %4175 = vmatpush3.bf16.msra.mxu1 %v4461_v58 }
 0x1e1   : > { %4176 = vmatprep.subr.bf16.mxu1 %v4464_v10 }
 0x1e2   : > { %4227 = vmatpush3.bf16.msra.mxu0 %v4466_v46 }
 0x1e3   : > { %4097 = vmatmul.mubr.bf16.gmra.mxu1 %v4967_v21 }
 0x1e4   : > { %4100 = vmatprep.mubr.bf16.mxu1 %v5006_v16  ;;  %4177 = vmatpush3.bf16.msra.mxu1 %v4464_v10 }
 0x1e5   : > { %4149 = vmatmul.mubr.bf16.gmra.mxu0 %v5241_v30  ;;  %4178 = vmatprep.subr.bf16.mxu1 %v4467_v49 }
 0x1e6   : > { %4152 = vmatprep.mubr.bf16.mxu0 %v5255_v15 }
 0x1e8   : > { %4179 = vmatpush3.bf16.msra.mxu1 %v4467_v49  ;;  %v4494_v49 = vld [vmem:[%s4837_s6 + $0x18] sm:$0xff]  }
 0x1e9   : > { %4260 = vmatprep.subr.bf16.mxu1 %v4468_v37  ;;  %v914_v52 = vunpack.c.l.bf16 %v4494_v49 }
 0x1eb   : > { %4101 = vmatmul.mubr.bf16.gmra.mxu1 %v5001_v6  ;;  %v953_v7 = vadd.f32 %v5349_v32, %v914_v52 }
 0x1ec   : > { %4104 = vmatprep.mubr.bf16.mxu1 %v5042_v11 }
 0x1ed   : > { %4153 = vmatmul.mubr.bf16.gmra.mxu0 %v5262_v8 }
 0x1ee   : > { %4156 = vmatprep.mubr.bf16.mxu0 %v5280_v36 }
 0x1f3   : > { %4105 = vmatmul.mubr.bf16.gmra.mxu1 %v5036_v62 }
 0x1f4   : > { %4108 = vmatprep.mubr.bf16.mxu1 %v5074_v29 }
 0x1f5   : > { %4157 = vmatmul.mubr.bf16.gmra.mxu0 %v5287_v14 }
 0x1f6   : > { %4160 = vmatprep.mubr.bf16.mxu0 %v5300_v1 }
 0x1fb   : > { %4109 = vmatmul.mubr.bf16.gmra.mxu1 %v5069_v23 }
 0x1fc   : > { %4112 = vmatprep.mubr.bf16.mxu1 %v5105_v54 }
 0x1fd   : > { %4161 = vmatmul.mubr.bf16.gmra.mxu0 %v5338_v9  ;;  %v915_v9 = vunpack.c.h.bf16 %v4494_v49 }
 0x1fe   : > { %4228 = vmatprep.mubr.bf16.mxu0 %v4883_v59 }
 0x203   : > { %4113 = vmatmul.mubr.bf16.gmra.mxu1 %v5101_v40 }
 0x204   : > { %v3942_v44 = vpop.f32.mrf.mxu0  ;;  %4180 = vmatprep.mubr.bf16.mxu1 %v4917_v27  ;;  %v4469_v27 = vld [vmem:[#allocation7 + $0x230] sm:$0xff]  }
 0x205   : > { %4229 = vmatmul.mubr.bf16.vlgmr.msra.gmra.mxu0 %v4908_v24  ;;  %v947_v24 = vadd.f32 %v5349_v32, %v908_v51  ;;  %v948_v51 = vadd.f32 %v5349_v32, %v909_v19 }
 0x206   : > { %4232 = vmatprep.mubr.bf16.mxu0 %v4903_v18  ;;  %v1335_v59 = vpop.f32.mrf.mxu0  ;;  %v950_v18 = vadd.f32 %v5349_v32, %v911_v13 }
 0x208   : > { %v3943_v48 = vpop.f32.mrf.mxu0 }
 0x20a   : > { %v1338_v58 = vpop.f32.mrf.mxu0 }
 0x20b   : > { %v3894_v46 = vpop.f32.mrf.mxu1  ;;  %4181 = vmatmul.mubr.bf16.vlgmr.msra.gmra.mxu1 %v4944_v57  ;;  %v4495_v57 = vld [vmem:[%s4837_s6 + $0x10] sm:$0xff]  }
 0x20c   : > { %v1206_v10 = vadd.f32 %v3894_v46, %v949_v61  ;;  %4261 = vmatpush3.bf16.msra.mxu1 %v4468_v37  ;;  %4184 = vmatprep.mubr.bf16.mxu1 %v4949_v60  ;;  %v912_v61 = vunpack.c.l.bf16 %v4495_v57  ;;  %v913_v14 = vunpack.c.h.bf16 %v4495_v57 }
 0x20d   : > { %v3946_v42 = vpop.f32.mrf.mxu0  ;;  %4233 = vmatmul.mubr.bf16.gmra.mxu0 %v4940_v56  ;;  %v1077_v53 = vpop.f32.mrf.mxu1  ;;  %4262 = vmatprep.subr.bf16.mxu1 %v4469_v27 }
 0x20e   : > { %v1204_v55 = vadd.f32 %v1077_v53, %v947_v24  ;;  %4236 = vmatprep.mubr.bf16.mxu0 %v4935_v50  ;;  %v5363_v37 = vadd.f32 %v3942_v44, %v1206_v10  ;;  %v4471_v50 = vld [vmem:[#allocation7 + $0x220] sm:$0xff]   ;;  %v951_v19 = vadd.f32 %v5349_v32, %v912_v61 }
 0x20f   : > { %v1351_v60 = vpop.f32.mrf.mxu0  ;;  %v3895_v46 = vpop.f32.mrf.mxu1 }
 0x210   : > { %v1207_v13 = vadd.f32 %v3895_v46, %v950_v18  ;;  %4263 = vmatpush3.bf16.msra.mxu1 %v4469_v27  ;;  %v5366_v56 = vadd.f32 %v1335_v59, %v1204_v55  ;;  %v954_v59 = vadd.f32 %v5349_v32, %v915_v9  ;;  %v4496_v18 = vld [vmem:[%s4837_s6 + $0x28] sm:$0xff]  }
 0x211   : > { %v3947_v1 = vpop.f32.mrf.mxu0  ;;  %v1080_v24 = vpop.f32.mrf.mxu1  ;;  %4264 = vmatprep.subr.bf16.mxu1 %v4470_v63  ;;  %v918_v49 = vunpack.c.l.bf16 %v4496_v18  ;;  %v919_v46 = vunpack.c.h.bf16 %v4496_v18 }
 0x212   : > { %v1205_v53 = vadd.f32 %v1080_v24, %v948_v51  ;;  %v5369_v44 = vadd.f32 %v3943_v48, %v1207_v13  ;;  %v4472_v51 = vld [vmem:[#allocation7 + $0x218] sm:$0xff]  }
 0x213   : > { %v1354_v10 = vpop.f32.mrf.mxu0  ;;  %v3898_v36 = vpop.f32.mrf.mxu1  ;;  %4185 = vmatmul.mubr.bf16.gmra.mxu1 %v4976_v33  ;;  %v952_v33 = vadd.f32 %v5349_v32, %v913_v14 }
 0x214   : > { %v1210_v27 = vadd.f32 %v3898_v36, %v953_v7  ;;  %4188 = vmatprep.mubr.bf16.mxu1 %v4981_v35  ;;  %4265 = vmatpush3.bf16.msra.mxu1 %v4470_v63  ;;  %v5375_v52 = vadd.f32 %v1338_v58, %v1205_v53  ;;  %v4497_v7 = vld [vmem:[%s4837_s6 + $0x20] sm:$0xff]   ;;  %v957_v58 = vadd.f32 %v5349_v32, %v918_v49 }
 0x215   : > { %v3950_v55 = vpop.f32.mrf.mxu0  ;;  %4237 = vmatmul.mubr.bf16.gmra.mxu0 %v4972_v31  ;;  %v1093_v48 = vpop.f32.mrf.mxu1  ;;  %4266 = vmatprep.subr.bf16.mxu1 %v4471_v50  ;;  %v916_v35 = vunpack.c.l.bf16 %v4497_v7 }
 0x216   : > { %v1208_v57 = vadd.f32 %v1093_v48, %v951_v19  ;;  %4240 = vmatprep.mubr.bf16.mxu0 %v4967_v21  ;;  %v5381_v36 = vadd.f32 %v3946_v42, %v1210_v27  ;;  %v4473_v21 = vld [vmem:[#allocation7 + $0x210] sm:$0xff]   ;;  %v917_v19 = vunpack.c.h.bf16 %v4497_v7 }
 0x217   : > { %v1367_v9 = vpop.f32.mrf.mxu0  ;;  %v3899_v61 = vpop.f32.mrf.mxu1  ;;  %v955_v14 = vadd.f32 %v5349_v32, %v916_v35  ;;  %v4499_v35 = vld [vmem:[%s4837_s6 + $0x30] sm:$0xff]  }
 0x218   : > { %v1211_v63 = vadd.f32 %v3899_v61, %v954_v59  ;;  %4267 = vmatpush3.bf16.msra.mxu1 %v4471_v50  ;;  %v5384_v31 = vadd.f32 %v1351_v60, %v1208_v57  ;;  %v958_v60 = vadd.f32 %v5349_v32, %v919_v46  ;;  %v4498_v50 = vld [vmem:[%s4837_s6 + $0x38] sm:$0xff]  }
 0x219   : > { %v3951_v13 = vpop.f32.mrf.mxu0  ;;  %v1096_v24 = vpop.f32.mrf.mxu1  ;;  %4268 = vmatprep.subr.bf16.mxu1 %v4472_v51  ;;  %v922_v18 = vunpack.c.l.bf16 %v4498_v50  ;;  %v923_v46 = vunpack.c.h.bf16 %v4498_v50 }
 0x21a   : > { %v1209_v53 = vadd.f32 %v1096_v24, %v952_v33  ;;  %v5387_v42 = vadd.f32 %v3947_v1, %v1211_v63  ;;  %v4474_v33 = vld [vmem:[#allocation7 + $0x208] sm:$0xff]  }
 0x21b   : > { %v1370_v27 = vpop.f32.mrf.mxu0  ;;  %v3902_v48 = vpop.f32.mrf.mxu1  ;;  %4189 = vmatmul.mubr.bf16.gmra.mxu1 %v5010_v17  ;;  %v956_v17 = vadd.f32 %v5349_v32, %v917_v19 }
 0x21c   : > { %v1214_v59 = vadd.f32 %v3902_v48, %v957_v58  ;;  %4192 = vmatprep.mubr.bf16.mxu1 %v5015_v20  ;;  %4269 = vmatpush3.bf16.msra.mxu1 %v4472_v51  ;;  %v5393_v49 = vadd.f32 %v1354_v10, %v1209_v53  ;;  %v920_v20 = vunpack.c.l.bf16 %v4499_v35  ;;  %v961_v10 = vadd.f32 %v5349_v32, %v922_v18 }
 0x21d   : > { %v3954_v57 = vpop.f32.mrf.mxu0  ;;  %4241 = vmatmul.mubr.bf16.gmra.mxu0 %v5006_v16  ;;  %v1109_v1 = vpop.f32.mrf.mxu1  ;;  %4270 = vmatprep.subr.bf16.mxu1 %v4473_v21  ;;  %v921_v48 = vunpack.c.h.bf16 %v4499_v35  ;;  %v4501_v35 = vld [vmem:[%s4837_s6 + $0x40] sm:$0xff]  }
 0x21e   : > { %v1212_v7 = vadd.f32 %v1109_v1, %v955_v14  ;;  %4244 = vmatprep.mubr.bf16.mxu0 %v5001_v6  ;;  %v5399_v61 = vadd.f32 %v3950_v55, %v1214_v59  ;;  %v4475_v6 = vld [vmem:[#allocation7 + $0x200] sm:$0xff]   ;;  %v959_v19 = vadd.f32 %v5349_v32, %v920_v20  ;;  %v924_v20 = vunpack.c.l.bf16 %v4501_v35 }
 0x21f   : > { %v1383_v63 = vpop.f32.mrf.mxu0  ;;  %v3903_v58 = vpop.f32.mrf.mxu1 }
 0x220   : > { %v1215_v51 = vadd.f32 %v3903_v58, %v958_v60  ;;  %4271 = vmatpush3.bf16.msra.mxu1 %v4473_v21  ;;  %v5402_v16 = vadd.f32 %v1367_v9, %v1212_v7  ;;  %v962_v9 = vadd.f32 %v5349_v32, %v923_v46  ;;  %v4500_v21 = vld [vmem:[%s4837_s6 + $0x48] sm:$0xff]  }
 0x221   : > { %v3955_v24 = vpop.f32.mrf.mxu0  ;;  %v1112_v53 = vpop.f32.mrf.mxu1  ;;  %4272 = vmatprep.subr.bf16.mxu1 %v4474_v33  ;;  %v926_v50 = vunpack.c.l.bf16 %v4500_v21 }
 0x222   : > { %v1213_v14 = vadd.f32 %v1112_v53, %v956_v17  ;;  %v5405_v55 = vadd.f32 %v3951_v13, %v1215_v51 }
 0x223   : > { %v1386_v59 = vpop.f32.mrf.mxu0  ;;  %v3906_v1 = vpop.f32.mrf.mxu1  ;;  %4193 = vmatmul.mubr.bf16.gmra.mxu1 %v5046_v12  ;;  %v960_v12 = vadd.f32 %v5349_v32, %v921_v48 }
 0x224   : > { %v1218_v60 = vadd.f32 %v3906_v1, %v961_v10  ;;  %4196 = vmatprep.mubr.bf16.mxu1 %v5052_v26  ;;  %4273 = vmatpush3.bf16.msra.mxu1 %v4474_v33  ;;  %v5411_v18 = vadd.f32 %v1370_v27, %v1213_v14  ;;  %v965_v27 = vadd.f32 %v5349_v32, %v926_v50  ;;  %v927_v33 = vunpack.c.h.bf16 %v4500_v21 }
 0x225   : > { %v3958_v7 = vpop.f32.mrf.mxu0  ;;  %4245 = vmatmul.mubr.bf16.gmra.mxu0 %v5042_v11  ;;  %v1125_v13 = vpop.f32.mrf.mxu1  ;;  %4274 = vmatprep.subr.bf16.mxu1 %v4475_v6 }
 0x226   : > { %v1216_v17 = vadd.f32 %v1125_v13, %v959_v19  ;;  %4248 = vmatprep.mubr.bf16.mxu0 %v5036_v62  ;;  %v5417_v26 = vadd.f32 %v3954_v57, %v1218_v60  ;;  %v963_v62 = vadd.f32 %v5349_v32, %v924_v20  ;;  %v925_v19 = vunpack.c.h.bf16 %v4501_v35 }
 0x227   : > { %v1399_v58 = vpop.f32.mrf.mxu0  ;;  %v3907_v51 = vpop.f32.mrf.mxu1 }
 0x228   : > { %v1219_v10 = vadd.f32 %v3907_v51, %v962_v9  ;;  %4275 = vmatpush3.bf16.msra.mxu1 %v4475_v6  ;;  %v5420_v11 = vadd.f32 %v1383_v63, %v1216_v17  ;;  %v966_v6 = vadd.f32 %v5349_v32, %v927_v33  ;;  %v4502_v63 = vld [vmem:[%s4837_s6 + $0x58] sm:$0xff]   ;;  %v964_v17 = vadd.f32 %v5349_v32, %v925_v19 }
 0x229   : > { %v3959_v46 = vpop.f32.mrf.mxu0  ;;  %v1128_v53 = vpop.f32.mrf.mxu1  ;;  %v930_v9 = vunpack.c.l.bf16 %v4502_v63 }
 0x22a   : > { %v1217_v14 = vadd.f32 %v1128_v53, %v960_v12  ;;  %v5423_v48 = vadd.f32 %v3955_v24, %v1219_v10  ;;  %v4503_v12 = vld [vmem:[%s4837_s6 + $0x50] sm:$0xff]   ;;  %v931_v10 = vunpack.c.h.bf16 %v4502_v63 }
 0x22b   : > { %v1402_v57 = vpop.f32.mrf.mxu0  ;;  %v3910_v1 = vpop.f32.mrf.mxu1  ;;  %4197 = vmatmul.mubr.bf16.gmra.mxu1 %v5078_v34  ;;  %v928_v34 = vunpack.c.l.bf16 %v4503_v12 }
 0x22c   : > { %v1222_v60 = vadd.f32 %v3910_v1, %v965_v27  ;;  %4200 = vmatprep.mubr.bf16.mxu1 %v5083_v38  ;;  %v5429_v21 = vadd.f32 %v1386_v59, %v1217_v14  ;;  %v969_v59 = vadd.f32 %v5349_v32, %v930_v9  ;;  %v929_v14 = vunpack.c.h.bf16 %v4503_v12 }
 0x22d   : > { %v3962_v50 = vpop.f32.mrf.mxu0  ;;  %4249 = vmatmul.mubr.bf16.gmra.mxu0 %v5074_v29  ;;  %v1141_v13 = vpop.f32.mrf.mxu1 }
 0x22e   : > { %v1220_v24 = vadd.f32 %v1141_v13, %v963_v62  ;;  %4252 = vmatprep.mubr.bf16.mxu0 %v5069_v23  ;;  %v5435_v35 = vadd.f32 %v3958_v7, %v1222_v60  ;;  %v967_v23 = vadd.f32 %v5349_v32, %v928_v34  ;;  %v970_v60 = vadd.f32 %v5349_v32, %v931_v10 }
 0x22f   : > { %v1415_v38 = vpop.f32.mrf.mxu0  ;;  %v3911_v20 = vpop.f32.mrf.mxu1 }
 0x230   : > { %v1223_v51 = vadd.f32 %v3911_v20, %v966_v6  ;;  %v5438_v27 = vadd.f32 %v1399_v58, %v1220_v24  ;;  %v4504_v58 = vld [vmem:[%s4837_s6 + $0x68] sm:$0xff]   ;;  %v968_v24 = vadd.f32 %v5349_v32, %v929_v14 }
 0x231   : > { %v3963_v29 = vpop.f32.mrf.mxu0  ;;  %v1144_v33 = vpop.f32.mrf.mxu1  ;;  %v934_v6 = vunpack.c.l.bf16 %v4504_v58 }
 0x232   : > { %v1221_v53 = vadd.f32 %v1144_v33, %v964_v17  ;;  %v5441_v62 = vadd.f32 %v3959_v46, %v1223_v51  ;;  %v4505_v17 = vld [vmem:[%s4837_s6 + $0x60] sm:$0xff]   ;;  %v935_v51 = vunpack.c.h.bf16 %v4504_v58 }
 0x233   : > { %v1418_v7 = vpop.f32.mrf.mxu0  ;;  %v3914_v19 = vpop.f32.mrf.mxu1  ;;  %4201 = vmatmul.mubr.bf16.gmra.mxu1 %v5109_v47  ;;  %v932_v47 = vunpack.c.l.bf16 %v4505_v17 }
 0x234   : > { %v1226_v1 = vadd.f32 %v3914_v19, %v969_v59  ;;  %4204 = vmatprep.mubr.bf16.mxu1 %v5114_v4  ;;  %v5447_v63 = vadd.f32 %v1402_v57, %v1221_v53  ;;  %v973_v57 = vadd.f32 %v5349_v32, %v934_v6  ;;  %v933_v53 = vunpack.c.h.bf16 %v4505_v17  ;;  %v4507_v17 = vld [vmem:[%s4837_s6 + $0x70] sm:$0xff]  }
 0x235   : > { %v3966_v9 = vpop.f32.mrf.mxu0  ;;  %4253 = vmatmul.mubr.bf16.gmra.mxu0 %v5105_v54  ;;  %v1157_v13 = vpop.f32.mrf.mxu1 }
 0x236   : > { %v1224_v46 = vadd.f32 %v1157_v13, %v967_v23  ;;  %4256 = vmatprep.mubr.bf16.mxu0 %v5101_v40  ;;  %v5453_v12 = vadd.f32 %v3962_v50, %v1226_v1  ;;  %v971_v40 = vadd.f32 %v5349_v32, %v932_v47  ;;  %v974_v1 = vadd.f32 %v5349_v32, %v935_v51 }
 0x237   : > { %v1431_v4 = vpop.f32.mrf.mxu0  ;;  %v3915_v34 = vpop.f32.mrf.mxu1  ;;  %v936_v47 = vunpack.c.l.bf16 %v4507_v17 }
 0x238   : > { %v1227_v20 = vadd.f32 %v3915_v34, %v970_v60  ;;  %v5456_v59 = vadd.f32 %v1415_v38, %v1224_v46  ;;  %v4506_v38 = vld [vmem:[%s4837_s6 + $0x78] sm:$0xff]   ;;  %v6112_v46 = vmov 0   ;;  %s4594_s6 = scalar_lea.vmem %s4593_s29, 8192 }
 0x239   : > { %v3967_v54 = vpop.f32.mrf.mxu0  ;;  %v1160_v10 = vpop.f32.mrf.mxu1  ;;  %v938_v60 = vunpack.c.l.bf16 %v4506_v38  ;;  %v939_v51 = vunpack.c.h.bf16 %v4506_v38  ;;  %p4596_p0 = scmp.lt.s32.totalorder %s4594_s6, %s4588_s22 }
 0x23a   : > { %v1225_v33 = vadd.f32 %v1160_v10, %v968_v24  ;;  %v5459_v23 = vadd.f32 %v3963_v29, %v1227_v20  ;;  %v972_v29 = vadd.f32 %v5349_v32, %v933_v53 }
 0x23b   : > { %v1434_v50 = vpop.f32.mrf.mxu0  ;;  %v3918_v14 = vpop.f32.mrf.mxu1  ;;  %4205 = vmatmul.mubr.bf16.gmra.mxu1 %v5138_v25  ;;  %p4597_p10 = por %p4596_p0, %p4595_p13 }
 0x23c   : > { %v1230_v19 = vadd.f32 %v3918_v14, %v973_v57  ;;  %4208 = vmatprep.mubr.bf16.mxu1 %v5292_v28  ;;  %v5465_v58 = vadd.f32 %v1418_v7, %v1225_v33  ;;  %v977_v57 = vadd.f32 %v5349_v32, %v938_v60 }
 0x23d   : > { %v3970_v6 = vpop.f32.mrf.mxu0  ;;  %v1173_v13 = vpop.f32.mrf.mxu1  ;;  %4257 = vmatmul.mubr.bf16.gmra.mxu0 %v6112_v46  ;;  %v975_v46 = vadd.f32 %v5349_v32, %v936_v47  ;;  %p4598_p3 = pnand %p4597_p10, %p4591_p12 }
 0x23e   : > { %6111 = vst [vmem:[#allocation17_spill] sm:$0xff] %v5465_v58  ;;  %v1228_v24 = vadd.f32 %v1173_v13, %v971_v40  ;;  %v5470_v34 = vadd.f32 %v3966_v9, %v1230_v19  ;;  %v937_v40 = vunpack.c.h.bf16 %v4507_v17  ;;  %v978_v19 = vadd.f32 %v5349_v32, %v939_v51 }
 0x23f   : > { %v1447_v25 = vpop.f32.mrf.mxu0  ;;  %v3919_v20 = vpop.f32.mrf.mxu1 }
 0x240   : > { %v1231_v28 = vadd.f32 %v3919_v20, %v974_v1  ;;  %v5473_v10 = vadd.f32 %v1431_v4, %v1228_v24  ;;  %v976_v24 = vadd.f32 %v5349_v32, %v937_v40 }
 0x241   : > { %v3971_v7 = vpop.f32.mrf.mxu0  ;;  %v1176_v33 = vpop.f32.mrf.mxu1 }
 0x242   : > { %v1229_v14 = vadd.f32 %v1176_v33, %v972_v29  ;;  %v5476_v13 = vadd.f32 %v3967_v54, %v1231_v28 }
 0x243   : > { %v1450_v53 = vpop.f32.mrf.mxu0  ;;  %v3922_v58 = vpop.f32.mrf.mxu1  ;;  %4209 = vmatmul.mubr.bf16.gmra.mxu1 %v4871_v43 }
 0x244   : > { %v1234_v9 = vadd.f32 %v3922_v58, %v977_v57  ;;  %4276 = vmatprep.mubr.bf16.mxu1 %v5160_v5  ;;  %v5481_v1 = vadd.f32 %v1434_v50, %v1229_v14 }
 0x245   : > { %v4038_v4 = vpop.f32.mrf.mxu0  ;;  %v1189_v38 = vpop.f32.mrf.mxu1 }
 0x246   : > { %v1232_v60 = vadd.f32 %v1189_v38, %v975_v46  ;;  %v5484_v29 = vadd.f32 %v3970_v6, %v1234_v9 }
 0x247   : > { %v1851_v54 = vpop.f32.mrf.mxu0  ;;  %v3923_v17 = vpop.f32.mrf.mxu1 }
 0x248   : > { %v1235_v47 = vadd.f32 %v3923_v17, %v978_v19  ;;  %v5486_v20 = vadd.f32 %v1447_v25, %v1232_v60 }
 0x249   : > { %v4039_v43 = vpop.f32.mrf.mxu0  ;;  %v1192_v58 = vpop.f32.mrf.mxu1 }
 0x24a   : > { %v1233_v28 = vadd.f32 %v1192_v58, %v976_v24  ;;  %v5488_v5 = vadd.f32 %v3971_v7, %v1235_v47 }
 0x24b   : > { %v1854_v57 = vpop.f32.mrf.mxu0  ;;  %v3990_v50 = vpop.f32.mrf.mxu1  ;;  %4277 = vmatmul.mubr.bf16.vlgmr.msra.gmra.mxu1 %v5174_v22 }
 0x24c   : > { %v1722_v51 = vadd.f32 %v3990_v50, %v5363_v37  ;;  %4280 = vmatprep.mubr.bf16.mxu1 %v5181_v39  ;;  %v5493_v32 = vadd.f32 %v1450_v53, %v1233_v28 }
 0x24d   : > { %v4042_v6 = vpop.f32.mrf.mxu0  ;;  %v1593_v33 = vpop.f32.mrf.mxu1 }
 0x24e   : > { %v1720_v25 = vadd.f32 %v1593_v33, %v5366_v56  ;;  %v5496_v14 = vadd.f32 %v4038_v4, %v1722_v51 }
 0x24f   : > { %v1867_v46 = vpop.f32.mrf.mxu0  ;;  %v3991_v40 = vpop.f32.mrf.mxu1 }
 0x250   : > { %v1723_v7 = vadd.f32 %v3991_v40, %v5369_v44  ;;  %v5499_v9 = vadd.f32 %v1851_v54, %v1720_v25 }
 0x251   : > { %v4043_v19 = vpop.f32.mrf.mxu0  ;;  %v1596_v22 = vpop.f32.mrf.mxu1 }
 0x252   : > { %v1721_v37 = vadd.f32 %v1596_v22, %v5375_v52  ;;  %v5502_v38 = vadd.f32 %v4039_v43, %v1723_v7 }
 0x253   : > { %v1870_v39 = vpop.f32.mrf.mxu0  ;;  %v3994_v53 = vpop.f32.mrf.mxu1  ;;  %4281 = vmatmul.mubr.bf16.gmra.mxu1 %v5194_v0 }
 0x254   : > { %v1726_v56 = vadd.f32 %v3994_v53, %v5381_v36  ;;  %4284 = vmatprep.mubr.bf16.mxu1 %v5201_v3  ;;  %v5507_v4 = vadd.f32 %v1854_v57, %v1721_v37 }
 0x255   : > { %v4046_v60 = vpop.f32.mrf.mxu0  ;;  %v1609_v44 = vpop.f32.mrf.mxu1 }
 0x256   : > { %v1724_v24 = vadd.f32 %v1609_v44, %v5384_v31  ;;  %v5510_v54 = vadd.f32 %v4042_v6, %v1726_v56 }
 0x257   : > { %v1883_v17 = vpop.f32.mrf.mxu0  ;;  %v3995_v52 = vpop.f32.mrf.mxu1 }
 0x258   : > { %v1727_v47 = vadd.f32 %v3995_v52, %v5387_v42  ;;  %v5513_v43 = vadd.f32 %v1867_v46, %v1724_v24 }
 0x259   : > { %v4047_v58 = vpop.f32.mrf.mxu0  ;;  %v1612_v0 = vpop.f32.mrf.mxu1 }
 0x25a   : > { %v1725_v36 = vadd.f32 %v1612_v0, %v5393_v49  ;;  %v5516_v28 = vadd.f32 %v4043_v19, %v1727_v47 }
 0x25b   : > { %v1886_v3 = vpop.f32.mrf.mxu0  ;;  %v3998_v57 = vpop.f32.mrf.mxu1  ;;  %4285 = vmatmul.mubr.bf16.gmra.mxu1 %v5214_v41 }
 0x25c   : > { %v1730_v31 = vadd.f32 %v3998_v57, %v5399_v61  ;;  %4288 = vmatprep.mubr.bf16.mxu1 %v5221_v45  ;;  %v5521_v50 = vadd.f32 %v1870_v39, %v1725_v36 }
 0x25d   : > { %v4050_v51 = vpop.f32.mrf.mxu0  ;;  %v1625_v42 = vpop.f32.mrf.mxu1 }
 0x25e   : > { %v1728_v6 = vadd.f32 %v1625_v42, %v5402_v16  ;;  %v5524_v33 = vadd.f32 %v4046_v60, %v1730_v31 }
 0x25f   : > { %v1899_v25 = vpop.f32.mrf.mxu0  ;;  %v3999_v49 = vpop.f32.mrf.mxu1 }
 0x260   : > { %v1731_v46 = vadd.f32 %v3999_v49, %v5405_v55  ;;  %v5527_v40 = vadd.f32 %v1883_v17, %v1728_v6  ;;  %v6113_v49 = vld [vmem:[#allocation13_spill] sm:$0xff] }
 0x261   : > { %v4051_v7 = vpop.f32.mrf.mxu0  ;;  %v1628_v41 = vpop.f32.mrf.mxu1 }
 0x262   : > { %v1729_v61 = vadd.f32 %v1628_v41, %v5411_v18  ;;  %v5530_v19 = vadd.f32 %v4047_v58, %v1731_v46  ;;  %v6114_v46 = vld [vmem:[#allocation14_spill] sm:$0xff] }
 0x263   : > { %v1902_v45 = vpop.f32.mrf.mxu0  ;;  %v4002_v22 = vpop.f32.mrf.mxu1  ;;  %4289 = vmatmul.mubr.bf16.gmra.mxu1 %v5234_v2 }
 0x264   : > { %v1734_v16 = vadd.f32 %v4002_v22, %v5417_v26  ;;  %4292 = vmatprep.mubr.bf16.mxu1 %v5241_v30  ;;  %v5535_v37 = vadd.f32 %v1886_v3, %v1729_v61 }
 0x265   : > { %v4054_v39 = vpop.f32.mrf.mxu0  ;;  %v1641_v55 = vpop.f32.mrf.mxu1 }
 0x266   : > { %v1732_v53 = vadd.f32 %v1641_v55, %v5420_v11  ;;  %v5538_v56 = vadd.f32 %v4050_v51, %v1734_v16 }
 0x267   : > { %v1915_v60 = vpop.f32.mrf.mxu0  ;;  %v4003_v18 = vpop.f32.mrf.mxu1 }
 0x268   : > { %v1735_v44 = vadd.f32 %v4003_v18, %v5423_v48  ;;  %v5541_v24 = vadd.f32 %v1899_v25, %v1732_v53 }
 0x269   : > { %v4055_v17 = vpop.f32.mrf.mxu0  ;;  %v1644_v2 = vpop.f32.mrf.mxu1 }
 0x26a   : > { %v1733_v26 = vadd.f32 %v1644_v2, %v5429_v21  ;;  %v5544_v52 = vadd.f32 %v4051_v7, %v1735_v44  ;;  %v6116_v2 = vld [vmem:[#allocation15_spill] sm:$0xff] }
 0x26b   : > { %v1918_v30 = vpop.f32.mrf.mxu0  ;;  %v4006_v47 = vpop.f32.mrf.mxu1  ;;  %4293 = vmatmul.mubr.bf16.gmra.mxu1 %v5255_v15 }
 0x26c   : > { %v1738_v11 = vadd.f32 %v4006_v47, %v5435_v35  ;;  %4296 = vmatprep.mubr.bf16.mxu1 %v5262_v8  ;;  %v5549_v58 = vadd.f32 %v1902_v45, %v1733_v26  ;;  %v6117_v26 = vld [vmem:[#allocation16_spill] sm:$0xff] }
 0x26d   : > { %v4058_v0 = vpop.f32.mrf.mxu0  ;;  %v1657_v48 = vpop.f32.mrf.mxu1 }
 0x26e   : > { %v1736_v36 = vadd.f32 %v1657_v48, %v5438_v27  ;;  %v5552_v3 = vadd.f32 %v4054_v39, %v1738_v11 }
 0x26f   : > { %v1931_v57 = vpop.f32.mrf.mxu0  ;;  %v4007_v21 = vpop.f32.mrf.mxu1 }
 0x270   : > { %v1739_v31 = vadd.f32 %v4007_v21, %v5441_v62  ;;  %v5555_v51 = vadd.f32 %v1915_v60, %v1736_v36  ;;  %v6115_v60 = vld [vmem:[#allocation17_spill] sm:$0xff] }
 0x271   : > { %v4059_v42 = vpop.f32.mrf.mxu0  ;;  %v1660_v15 = vpop.f32.mrf.mxu1 }
 0x272   : > { %v1737_v35 = vadd.f32 %v1660_v15, %v5447_v63  ;;  %v5558_v6 = vadd.f32 %v4055_v17, %v1739_v31 }
 0x273   : > { %v1934_v8 = vpop.f32.mrf.mxu0  ;;  %v4010_v25 = vpop.f32.mrf.mxu1  ;;  %4297 = vmatmul.mubr.bf16.gmra.mxu1 %v6113_v49 }
 0x274   : > { %v1742_v27 = vadd.f32 %v4010_v25, %v5453_v12  ;;  %4300 = vmatprep.mubr.bf16.mxu1 %v6114_v46  ;;  %v5563_v7 = vadd.f32 %v1918_v30, %v1737_v35  ;;  %v6118_v25 = vld [vmem:[#allocation12_spill] sm:$0xff] }
 0x275   : > { %v4062_v41 = vpop.f32.mrf.mxu0  ;;  %v1673_v62 = vpop.f32.mrf.mxu1 }
 0x276   : > { %v1740_v61 = vadd.f32 %v1673_v62, %v5456_v59  ;;  %v5566_v45 = vadd.f32 %v4058_v0, %v1742_v27 }
 0x277   : > { %v1947_v22 = vpop.f32.mrf.mxu0  ;;  %v4011_v63 = vpop.f32.mrf.mxu1 }
 0x278   : > { %v1743_v16 = vadd.f32 %v4011_v63, %v5459_v23  ;;  %v5569_v39 = vadd.f32 %v1931_v57, %v1740_v61 }
 0x279   : > { %v4063_v55 = vpop.f32.mrf.mxu0  ;;  %v1676_v53 = vpop.f32.mrf.mxu1 }
 0x27a   : > { %v1741_v12 = vadd.f32 %v1676_v53, %v6115_v60  ;;  %v5572_v18 = vadd.f32 %v4059_v42, %v1743_v16 }
 0x27b   : > { %v1950_v44 = vpop.f32.mrf.mxu0  ;;  %v4014_v17 = vpop.f32.mrf.mxu1  ;;  %4301 = vmatmul.mubr.bf16.gmra.mxu1 %v6116_v2 }
 0x27c   : > { %v1746_v59 = vadd.f32 %v4014_v17, %v5470_v34  ;;  %4304 = vmatprep.mubr.bf16.mxu1 %v6117_v26  ;;  %v5577_v30 = vadd.f32 %v1934_v8, %v1741_v12 }
 0x27d   : > { %v4066_v47 = vpop.f32.mrf.mxu0  ;;  %v1689_v23 = vpop.f32.mrf.mxu1 }
 0x27e   : > { %v1744_v11 = vadd.f32 %v1689_v23, %v5473_v10  ;;  %v5580_v0 = vadd.f32 %v4062_v41, %v1746_v59 }
 0x27f   : > { %v1963_v48 = vpop.f32.mrf.mxu0  ;;  %v4015_v36 = vpop.f32.mrf.mxu1 }
 0x280   : > { %v1747_v57 = vadd.f32 %v4015_v36, %v5476_v13  ;;  %v5583_v21 = vadd.f32 %v1947_v22, %v1744_v11 }
 0x281   : > { %v4067_v31 = vpop.f32.mrf.mxu0  ;;  %v1692_v42 = vpop.f32.mrf.mxu1 }
 0x282   : > { %v1745_v34 = vadd.f32 %v1692_v42, %v5481_v1  ;;  %v5586_v15 = vadd.f32 %v4063_v55, %v1747_v57 }
 0x283   : > { %v1966_v35 = vpop.f32.mrf.mxu0  ;;  %v4018_v8 = vpop.f32.mrf.mxu1  ;;  %4305 = vmatmul.mubr.bf16.gmra.mxu1 %v6118_v25 }
 0x284   : > { %v1750_v10 = vadd.f32 %v4018_v8, %v5484_v29  ;;  %v5590_v49 = vadd.f32 %v1950_v44, %v1745_v34 }
 0x285   : > { %v5592_v27 = vpop.f32.mrf.mxu0  ;;  %v1705_v46 = vpop.f32.mrf.mxu1 }
 0x286   : > { %v1748_v13 = vadd.f32 %v1705_v46, %v5486_v20  ;;  %v5595_v41 = vadd.f32 %v4066_v47, %v1750_v10 }
 0x287   : > { %v5597_v62 = vpop.f32.mrf.mxu0  ;;  %v4019_v1 = vpop.f32.mrf.mxu1 }
 0x288   : > { %v1751_v61 = vadd.f32 %v4019_v1, %v5488_v5  ;;  %v5600_v22 = vadd.f32 %v1963_v48, %v1748_v13 }
 0x289   : > { %v5602_v63 = vpop.f32.mrf.mxu0  ;;  %v1708_v16 = vpop.f32.mrf.mxu1 }
 0x28a   : > { %v1749_v29 = vadd.f32 %v1708_v16, %v5493_v32  ;;  %v5605_v55 = vadd.f32 %v4067_v31, %v1751_v61 }
 0x28b   : > { %v5607_v53 = vpop.f32.mrf.mxu0  ;;  %v4086_v60 = vpop.f32.mrf.mxu1 }
 0x28c   : > { %v5610_v20 = vadd.f32 %v4086_v60, %v5496_v14  ;;  %v5612_v12 = vadd.f32 %v1966_v35, %v1749_v29 }
 0x28d   : > { %v5614_v44 = vpop.f32.mrf.mxu0  ;;  %v2109_v5 = vpop.f32.mrf.mxu1 }
 0x28e   : > { %v5617_v17 = vadd.f32 %v2109_v5, %v5499_v9 }
 0x28f   : > { %v5619_v2 = vpop.f32.mrf.mxu0  ;;  %v4087_v59 = vpop.f32.mrf.mxu1 }
 0x290   : > { %v5622_v32 = vadd.f32 %v4087_v59, %v5502_v38 }
 0x291   : > { %v5624_v26 = vpop.f32.mrf.mxu0  ;;  %v2112_v47 = vpop.f32.mrf.mxu1 }
 0x292   : > { %v5627_v14 = vadd.f32 %v2112_v47, %v5507_v4 }
 0x293   : > { %v5629_v23 = vpop.f32.mrf.mxu0  ;;  %v4090_v11 = vpop.f32.mrf.mxu1 }
 0x294   : > { %v5632_v48 = vadd.f32 %v4090_v11, %v5510_v54 }
 0x295   : > { %v5634_v9 = vpop.f32.mrf.mxu0  ;;  %v2125_v36 = vpop.f32.mrf.mxu1 }
 0x296   : > { %v5637_v57 = vadd.f32 %v2125_v36, %v5513_v43 }
 0x297   : > { %v5639_v38 = vpop.f32.mrf.mxu0  ;;  %v4091_v31 = vpop.f32.mrf.mxu1 }
 0x298   : > { %v5642_v42 = vadd.f32 %v4091_v31, %v5516_v28 }
 0x299   : > { %v5644_v4 = vpop.f32.mrf.mxu0  ;;  %v2128_v34 = vpop.f32.mrf.mxu1 }
 0x29a   : > { %v5647_v35 = vadd.f32 %v2128_v34, %v5521_v50 }
 0x29b   : > { %v5649_v54 = vpop.f32.mrf.mxu0  ;;  %v4094_v8 = vpop.f32.mrf.mxu1 }
 0x29c   : > { %v5652_v25 = vadd.f32 %v4094_v8, %v5524_v33 }
 0x29d   : > { %v5654_v43 = vpop.f32.mrf.mxu0  ;;  %v2141_v10 = vpop.f32.mrf.mxu1 }
 0x29e   : > { %v5657_v46 = vadd.f32 %v2141_v10, %v5527_v40 }
 0x29f   : > { %v5659_v28 = vpop.f32.mrf.mxu0  ;;  %v4095_v13 = vpop.f32.mrf.mxu1 }
 0x2a0   : > { %v5662_v1 = vadd.f32 %v4095_v13, %v5530_v19 }
 0x2a1   : > { %v5664_v50 = vpop.f32.mrf.mxu0  ;;  %v2144_v61 = vpop.f32.mrf.mxu1 }
 0x2a2   : > { %v5667_v16 = vadd.f32 %v2144_v61, %v5535_v37 }
 0x2a3   : > { %v5669_v33 = vpop.f32.mrf.mxu0  ;;  %v4098_v29 = vpop.f32.mrf.mxu1 }
 0x2a4   : > { %6119 = vst [vmem:[#allocation13_spill] sm:$0xff] %v5669_v33  ;;  %v5672_v60 = vadd.f32 %v4098_v29, %v5538_v56 }
 0x2a5   : > { %v5674_v40 = vpop.f32.mrf.mxu0  ;;  %v2157_v5 = vpop.f32.mrf.mxu1 }
 0x2a6   : > { %6120 = vst [vmem:[#allocation14_spill] sm:$0xff] %v5674_v40  ;;  %v5677_v59 = vadd.f32 %v2157_v5, %v5541_v24 }
 0x2a7   : > { %v5679_v19 = vpop.f32.mrf.mxu0  ;;  %v4099_v47 = vpop.f32.mrf.mxu1 }
 0x2a8   : > { %6121 = vst [vmem:[#allocation17_spill] sm:$0xff] %v5679_v19  ;;  %v5682_v11 = vadd.f32 %v4099_v47, %v5544_v52 }
 0x2a9   : > { %v5684_v37 = vpop.f32.mrf.mxu0  ;;  %v2160_v36 = vpop.f32.mrf.mxu1 }
 0x2aa   : > { %6122 = vst [vmem:[#allocation15_spill] sm:$0xff] %v5684_v37  ;;  %v5687_v31 = vadd.f32 %v2160_v36, %v5549_v58 }
 0x2ab   : > { %v5689_v56 = vpop.f32.mrf.mxu0  ;;  %v4102_v34 = vpop.f32.mrf.mxu1 }
 0x2ac   : > { %6123 = vst [vmem:[#allocation16_spill] sm:$0xff] %v5687_v31  ;;  %6124 = vst [vmem:[#allocation12_spill] sm:$0xff] %v5689_v56  ;;  %v5692_v8 = vadd.f32 %v4102_v34, %v5552_v3 }
 0x2ad   : > { %v5694_v24 = vpop.f32.mrf.mxu0  ;;  %v2173_v10 = vpop.f32.mrf.mxu1 }
 0x2ae   : > { %6125 = vst [vmem:[#allocation18_spill] sm:$0xff] %v5692_v8  ;;  %6126 = vst [vmem:[#allocation19_spill] sm:$0xff] %v5694_v24  ;;  %v5697_v13 = vadd.f32 %v2173_v10, %v5555_v51 }
 0x2af   : > { %v5699_v52 = vpop.f32.mrf.mxu0  ;;  %v4103_v61 = vpop.f32.mrf.mxu1 }
 0x2b0   : > { %6127 = vst [vmem:[#allocation20_spill] sm:$0xff] %v5697_v13  ;;  %6128 = vst [vmem:[#allocation21_spill] sm:$0xff] %v5699_v52  ;;  %v5702_v29 = vadd.f32 %v4103_v61, %v5558_v6 }
 0x2b1   : > { %v5704_v58 = vpop.f32.mrf.mxu0  ;;  %v2176_v5 = vpop.f32.mrf.mxu1 }
 0x2b2   : > { %6129 = vst [vmem:[#allocation22_spill] sm:$0xff] %v5702_v29  ;;  %6130 = vst [vmem:[#allocation23_spill] sm:$0xff] %v5704_v58  ;;  %v5707_v47 = vadd.f32 %v2176_v5, %v5563_v7 }
 0x2b3   : > { %v5709_v3 = vpop.f32.mrf.mxu0  ;;  %v4106_v36 = vpop.f32.mrf.mxu1 }
 0x2b4   : > { %6131 = vst [vmem:[#allocation24_spill] sm:$0xff] %v5707_v47  ;;  %6132 = vst [vmem:[#allocation25_spill] sm:$0xff] %v5709_v3  ;;  %v5712_v34 = vadd.f32 %v4106_v36, %v5566_v45 }
 0x2b5   : > { %v5714_v51 = vpop.f32.mrf.mxu0  ;;  %v2189_v10 = vpop.f32.mrf.mxu1 }
 0x2b6   : > { %6133 = vst [vmem:[#allocation26_spill] sm:$0xff] %v5712_v34  ;;  %6134 = vst [vmem:[#allocation27_spill] sm:$0xff] %v5714_v51  ;;  %v5717_v52 = vadd.f32 %v2189_v10, %v5569_v39 }
 0x2b7   : > { %v5719_v6 = vpop.f32.mrf.mxu0  ;;  %v4107_v61 = vpop.f32.mrf.mxu1 }
 0x2b8   : > { %6135 = vst [vmem:[#allocation28_spill] sm:$0xff] %v5717_v52  ;;  %6136 = vst [vmem:[#allocation29_spill] sm:$0xff] %v5719_v6  ;;  %v5722_v58 = vadd.f32 %v4107_v61, %v5572_v18 }
 0x2b9   : > { %v5724_v7 = vpop.f32.mrf.mxu0  ;;  %v2192_v5 = vpop.f32.mrf.mxu1 }
 0x2ba   : > { %6137 = vst [vmem:[#allocation30_spill] sm:$0xff] %v5722_v58  ;;  %6138 = vst [vmem:[#allocation31_spill] sm:$0xff] %v5724_v7  ;;  %v5727_v3 = vadd.f32 %v2192_v5, %v5577_v30 }
 0x2bb   : > { %v5729_v45 = vpop.f32.mrf.mxu0  ;;  %v4110_v36 = vpop.f32.mrf.mxu1 }
 0x2bc   : > { %6139 = vst [vmem:[#allocation32_spill] sm:$0xff] %v5727_v3  ;;  %6140 = vst [vmem:[#allocation33_spill] sm:$0xff] %v5729_v45  ;;  %v5732_v51 = vadd.f32 %v4110_v36, %v5580_v0 }
 0x2bd   : > { %v5734_v39 = vpop.f32.mrf.mxu0  ;;  %v2205_v10 = vpop.f32.mrf.mxu1 }
 0x2be   : > { %6141 = vst [vmem:[#allocation34_spill] sm:$0xff] %v5732_v51  ;;  %6142 = vst [vmem:[#allocation35_spill] sm:$0xff] %v5734_v39  ;;  %v5737_v6 = vadd.f32 %v2205_v10, %v5583_v21 }
 0x2bf   : > { %v5739_v18 = vpop.f32.mrf.mxu0  ;;  %v4111_v61 = vpop.f32.mrf.mxu1 }
 0x2c0   : > { %6143 = vst [vmem:[#allocation36_spill] sm:$0xff] %v5737_v6  ;;  %6144 = vst [vmem:[#allocation37_spill] sm:$0xff] %v5739_v18  ;;  %v5742_v7 = vadd.f32 %v4111_v61, %v5586_v15 }
 0x2c1   : > { %v2208_v30 = vpop.f32.mrf.mxu1  ;;  %v5747_v45 = vpop.f32.mrf.mxu0 }
 0x2c2   : > { %6145 = vst [vmem:[#allocation38_spill] sm:$0xff] %v5742_v7  ;;  %v5745_v5 = vadd.f32 %v2208_v30, %v5590_v49  ;;  %6147 = vst [vmem:[#allocation40_spill] sm:$0xff] %v5747_v45 }
 0x2c3   : > { %v4114_v0 = vpop.f32.mrf.mxu1  ;;  %v5755_v10 = vpop.f32.mrf.mxu0 }
 0x2c4   : > { %6146 = vst [vmem:[#allocation39_spill] sm:$0xff] %v5745_v5  ;;  %v5750_v36 = vadd.f32 %v4114_v0, %v5595_v41  ;;  %6150 = vst [vmem:[#allocation43_spill] sm:$0xff] %v5755_v10 }
 0x2c5   : > { %v2221_v39 = vpop.f32.mrf.mxu1  ;;  %v4230_v30 = vpop.f32.mrf.mxu0 }
 0x2c6   : > { %6148 = vst [vmem:[#allocation41_spill] sm:$0xff] %v5750_v36  ;;  %v5753_v21 = vadd.f32 %v2221_v39, %v5600_v22 }
 0x2c7   : > { %v4115_v18 = vpop.f32.mrf.mxu1  ;;  %v2883_v7 = vpop.f32.mrf.mxu0 }
 0x2c8   : > { %6149 = vst [vmem:[#allocation42_spill] sm:$0xff] %v5753_v21  ;;  %v5758_v15 = vadd.f32 %v4115_v18, %v5605_v55 }
 0x2c9   : > { %v2224_v61 = vpop.f32.mrf.mxu1  ;;  %v4231_v36 = vpop.f32.mrf.mxu0 }
 0x2ca   : > { %6151 = vst [vmem:[#allocation44_spill] sm:$0xff] %v5758_v15  ;;  %v5761_v49 = vadd.f32 %v2224_v61, %v5612_v12 }
 0x2cb   : > { %v4182_v45 = vpop.f32.mrf.mxu1  ;;  %v5765_v39 = vpop.f32.mrf.mxu0 }
 0x2cc   : > { %6152 = vst [vmem:[#allocation45_spill] sm:$0xff] %v5761_v49 }
 0x2cd   : > { %v2625_v5 = vpop.f32.mrf.mxu1  ;;  %v5771_v18 = vpop.f32.mrf.mxu0 }
 0x2cf   : > { %v4183_v41 = vpop.f32.mrf.mxu1  ;;  %v5777_v49 = vpop.f32.mrf.mxu0 }
 0x2d1   : > { %v2628_v0 = vpop.f32.mrf.mxu1  ;;  %v5783_v51 = vpop.f32.mrf.mxu0 }
 0x2d3   : > { %v4186_v6 = vpop.f32.mrf.mxu1  ;;  %v5789_v52 = vpop.f32.mrf.mxu0 }
 0x2d5   : > { %v5763_v22 = vpop.f32.mrf.mxu1  ;;  %v5795_v56 = vpop.f32.mrf.mxu0 }
 0x2d7   : > { %v5767_v10 = vpop.f32.mrf.mxu1  ;;  %v5801_v29 = vpop.f32.mrf.mxu0 }
 0x2d9   : > { %v5769_v55 = vpop.f32.mrf.mxu1  ;;  %v5807_v40 = vpop.f32.mrf.mxu0 }
 0x2db   : > { %v5773_v12 = vpop.f32.mrf.mxu1 }
 0x2dd   : > { %v5775_v61 = vpop.f32.mrf.mxu1 }
 0x2df   : > { %v5779_v15 = vpop.f32.mrf.mxu1 }
 0x2e1   : > { %v5781_v21 = vpop.f32.mrf.mxu1 }
 0x2e3   : > { %v5785_v3 = vpop.f32.mrf.mxu1 }
 0x2e5   : > { %v5787_v58 = vpop.f32.mrf.mxu1 }
 0x2e6   : > { %6153 = vst [vmem:[#allocation46_spill] sm:$0xff] %v5787_v58 }
 0x2e7   : > { %v5791_v24 = vpop.f32.mrf.mxu1 }
 0x2e8   : > { %6154 = vst [vmem:[#allocation47_spill] sm:$0xff] %v5791_v24  ;;  %v5813_v24 = vpop.f32.mrf.mxu0 }
 0x2e9   : > { %v5793_v34 = vpop.f32.mrf.mxu1  ;;  %6162 = vst [vmem:[#allocation55_spill] sm:$0xff] %v5813_v24 }
 0x2ea   : > { %6155 = vst [vmem:[#allocation48_spill] sm:$0xff] %v5793_v34 }
 0x2eb   : > { %v5797_v47 = vpop.f32.mrf.mxu1 }
 0x2ec   : > { %6156 = vst [vmem:[#allocation49_spill] sm:$0xff] %v5797_v47  ;;  %v5819_v47 = vpop.f32.mrf.mxu0 }
 0x2ed   : > { %v5799_v37 = vpop.f32.mrf.mxu1  ;;  %6165 = vst [vmem:[#allocation58_spill] sm:$0xff] %v5819_v47 }
 0x2ee   : > { %6157 = vst [vmem:[#allocation50_spill] sm:$0xff] %v5799_v37 }
 0x2ef   : > { %v5803_v19 = vpop.f32.mrf.mxu1 }
 0x2f0   : > { %6158 = vst [vmem:[#allocation51_spill] sm:$0xff] %v5803_v19  ;;  %v5825_v19 = vpop.f32.mrf.mxu0 }
 0x2f1   : > { %v5805_v13 = vpop.f32.mrf.mxu1  ;;  %6168 = vst [vmem:[#allocation61_spill] sm:$0xff] %v5825_v19 }
 0x2f2   : > { %6159 = vst [vmem:[#allocation52_spill] sm:$0xff] %v5805_v13 }
 0x2f3   : > { %v5809_v8 = vpop.f32.mrf.mxu1 }
 0x2f4   : > { %6160 = vst [vmem:[#allocation53_spill] sm:$0xff] %v5809_v8 }
 0x2f5   : > { %v5811_v33 = vpop.f32.mrf.mxu1 }
 0x2f6   : > { %6161 = vst [vmem:[#allocation54_spill] sm:$0xff] %v5811_v33  ;;  %v5831_v33 = vpop.f32.mrf.mxu0 }
 0x2f7   : > { %v5815_v34 = vpop.f32.mrf.mxu1  ;;  %6171 = vst [vmem:[#allocation64_spill] sm:$0xff] %v5831_v33 }
 0x2f8   : > { %6163 = vst [vmem:[#allocation56_spill] sm:$0xff] %v5815_v34 }
 0x2f9   : > { %v5817_v31 = vpop.f32.mrf.mxu1 }
 0x2fa   : > { %6164 = vst [vmem:[#allocation57_spill] sm:$0xff] %v5817_v31  ;;  %v2496_v31 = vadd.f32 %v5592_v27, %v5610_v20  ;;  %v2495_v27 = vadd.f32 %v5607_v53, %v5627_v14  ;;  %v2501_v53 = vadd.f32 %v5624_v26, %v5642_v42 }
 0x2fb   : > { %v5821_v37 = vpop.f32.mrf.mxu1 }
 0x2fc   : > { %6166 = vst [vmem:[#allocation59_spill] sm:$0xff] %v5821_v37  ;;  %v2754_v47 = vadd.f32 %v4182_v45, %v2496_v31  ;;  %v5841_v37 = vpop.f32.mrf.mxu0  ;;  %v2759_v26 = vadd.f32 %v5767_v10, %v2501_v53 }
 0x2fd   : > { %v5823_v58 = vpop.f32.mrf.mxu1 }
 0x2fe   : > { %6167 = vst [vmem:[#allocation60_spill] sm:$0xff] %v5823_v58  ;;  %v2494_v58 = vadd.f32 %v5597_v62, %v5617_v17  ;;  %v3012_v20 = vadd.f32 %v4230_v30, %v2754_v47  ;;  %v5852_v31 = vpop.f32.mrf.mxu0  ;;  %v2753_v62 = vadd.f32 %v2628_v0, %v2495_v27  ;;  %v2500_v17 = vadd.f32 %v5614_v44, %v5632_v48 }
 0x2ff   : > { %v5827_v13 = vpop.f32.mrf.mxu1  ;;  %v2502_v0 = vadd.f32 %v5639_v38, %v5657_v46 }
 0x300   : > { %6169 = vst [vmem:[#allocation62_spill] sm:$0xff] %v5827_v13  ;;  %v2752_v13 = vadd.f32 %v2625_v5, %v2494_v58  ;;  %v2758_v5 = vadd.f32 %v4186_v6, %v2500_v17  ;;  %v5860_v14 = vpop.f32.mrf.mxu0  ;;  %v3011_v48 = vadd.f32 %v5765_v39, %v2753_v62  ;;  %v2504_v6 = vadd.f32 %v5634_v9, %v5652_v25 }
 0x301   : > { %v5829_v8 = vpop.f32.mrf.mxu1 }
 0x302   : > { %6170 = vst [vmem:[#allocation63_spill] sm:$0xff] %v5829_v8  ;;  %v2497_v8 = vadd.f32 %v5602_v63, %v5622_v32  ;;  %v3010_v58 = vadd.f32 %v2883_v7, %v2752_v13  ;;  %v2498_v63 = vadd.f32 %v5619_v2, %v5637_v57  ;;  %v2499_v57 = vadd.f32 %v5629_v23, %v5647_v35  ;;  %v5874_v7 = vpop.f32.mrf.mxu0 }
 0x303   : > { %v5833_v24 = vpop.f32.mrf.mxu1  ;;  %v3016_v13 = vadd.f32 %v5771_v18, %v2758_v5  ;;  %v2762_v39 = vadd.f32 %v5773_v12, %v2504_v6  ;;  %v3017_v18 = vadd.f32 %v5783_v51, %v2759_v26  ;;  %v6180_v26 = vld [vmem:[#allocation58_spill] sm:$0xff] }
 0x304   : > { %6172 = vst [vmem:[#allocation65_spill] sm:$0xff] %v5833_v24  ;;  %v2755_v24 = vadd.f32 %v4183_v41, %v2497_v8  ;;  %v2756_v30 = vadd.f32 %v5763_v22, %v2498_v63  ;;  %v5886_v27 = vpop.f32.mrf.mxu0 }
 0x305   : > { %v5837_v34 = vpop.f32.mrf.mxu1  ;;  %v3020_v17 = vadd.f32 %v5795_v56, %v2762_v39 }
 0x306   : > { %v3014_v10 = vadd.f32 %v5777_v49, %v2756_v30  ;;  %v2760_v49 = vadd.f32 %v5775_v61, %v2502_v0  ;;  %v2508_v61 = vadd.f32 %v5654_v43, %v5672_v60  ;;  %v6176_v30 = vld [vmem:[#allocation55_spill] sm:$0xff] }
 0x307   : > { %v5843_v19 = vpop.f32.mrf.mxu1 }
 0x308   : > { %6173 = vst [vmem:[#allocation66_spill] sm:$0xff] %v5843_v19  ;;  %v2766_v56 = vadd.f32 %v5785_v3, %v2508_v61  ;;  %v6191_v61 = vld [vmem:[#allocation50_spill] sm:$0xff] }
 0x309   : > { %v5847_v33 = vpop.f32.mrf.mxu1 }
 0x30a   : > { %6174 = vst [vmem:[#allocation67_spill] sm:$0xff] %v5847_v33  ;;  %v3013_v33 = vadd.f32 %v4231_v36, %v2755_v24  ;;  %v2757_v36 = vadd.f32 %v5769_v55, %v2499_v57  ;;  %v2505_v55 = vadd.f32 %v5644_v4, %v5662_v1 }
 0x30b   : > { %v4278_v45 = vpop.f32.mrf.mxu1 }
 0x30c   : > { %v3270_v19 = vadd.f32 %v4278_v45, %v3012_v20  ;;  %v3015_v12 = vadd.f32 %v5789_v52, %v2757_v36  ;;  %v2503_v45 = vadd.f32 %v5649_v54, %v5667_v16  ;;  %v2763_v51 = vadd.f32 %v5779_v15, %v2505_v55 }
 0x30d   : > { %v3141_v32 = vpop.f32.mrf.mxu1  ;;  %v3018_v15 = vadd.f32 %v5801_v29, %v2760_v49 }
 0x30e   : > { %v3302_v8 = vmax.f32 %v3270_v19, 0.0  ;;  %v3268_v41 = vadd.f32 %v3141_v32, %v3010_v58  ;;  %v5898_v58 = vpop.f32.mrf.mxu0  ;;  %v2761_v52 = vadd.f32 %v5781_v21, %v2503_v45  ;;  %v2506_v32 = vadd.f32 %v5659_v28, %v5677_v59 }
 0x30f   : > { %v4279_v47 = vpop.f32.mrf.mxu1  ;;  %v2509_v21 = vadd.f32 %v5664_v50, %v5682_v11 }
 0x310   : > { %3334 = vst [vmem:[%s5863_s13 + $0x10] sm:$0xff] %v3302_v8  ;;  %v3300_v44 = vmax.f32 %v3268_v41, 0.0  ;;  %v3271_v2 = vadd.f32 %v4279_v47, %v3013_v33  ;;  %v3021_v8 = vadd.f32 %v5807_v40, %v2763_v51  ;;  %v5910_v41 = vpop.f32.mrf.mxu0  ;;  %v6175_v47 = vld [vmem:[#allocation46_spill] sm:$0xff]  ;;  %v3019_v3 = vadd.f32 %v6176_v30, %v2761_v52  ;;  %v6190_v51 = vld [vmem:[#allocation15_spill] sm:$0xff] }
 0x311   : > { %v3144_v19 = vpop.f32.mrf.mxu1  ;;  %v2764_v29 = vadd.f32 %v6175_v47, %v2506_v32  ;;  %v6193_v32 = vld [vmem:[#allocation12_spill] sm:$0xff]  ;;  %v6195_v47 = vld [vmem:[#allocation26_spill] sm:$0xff] }
 0x312   : > { %3332 = vst [vmem:[%s5863_s13] sm:$0xff] %v3300_v44  ;;  %v3303_v42 = vmax.f32 %v3271_v2, 0.0  ;;  %v3269_v24 = vadd.f32 %v3144_v19, %v3011_v48  ;;  %v6177_v44 = vld [vmem:[#allocation16_spill] sm:$0xff]  ;;  %v6178_v2 = vld [vmem:[#allocation13_spill] sm:$0xff]  ;;  %v6179_v19 = vld [vmem:[#allocation47_spill] sm:$0xff] }
 0x313   : > { %v4282_v33 = vpop.f32.mrf.mxu1  ;;  %v2507_v48 = vadd.f32 %v6178_v2, %v6177_v44  ;;  %v2767_v40 = vadd.f32 %v6179_v19, %v2509_v21  ;;  %v6199_v19 = vld [vmem:[#allocation21_spill] sm:$0xff] }
 0x314   : > { %3335 = vst [vmem:[%s5863_s13 + $0x18] sm:$0xff] %v3303_v42  ;;  %v3301_v23 = vmax.f32 %v3269_v24, 0.0  ;;  %v3274_v35 = vadd.f32 %v4282_v33, %v3016_v13  ;;  %v3024_v42 = vadd.f32 %v6180_v26, %v2766_v56  ;;  %v6181_v24 = vld [vmem:[#allocation18_spill] sm:$0xff]  ;;  %v5922_v33 = vpop.f32.mrf.mxu0 }
 0x315   : > { %v3157_v22 = vpop.f32.mrf.mxu1  ;;  %v6182_v13 = vld [vmem:[#allocation14_spill] sm:$0xff] }
 0x316   : > { %3333 = vst [vmem:[%s5863_s13 + $0x8] sm:$0xff] %v3301_v23  ;;  %v3306_v9 = vmax.f32 %v3274_v35, 0.0  ;;  %v3272_v25 = vadd.f32 %v3157_v22, %v3014_v10  ;;  %v2512_v6 = vadd.f32 %v6182_v13, %v6181_v24  ;;  %v6183_v23 = vld [vmem:[#allocation48_spill] sm:$0xff]  ;;  %v6184_v22 = vld [vmem:[#allocation61_spill] sm:$0xff] }
 0x317   : > { %v4283_v20 = vpop.f32.mrf.mxu1  ;;  %v2765_v35 = vadd.f32 %v6183_v23, %v2507_v48  ;;  %v3022_v39 = vadd.f32 %v6184_v22, %v2764_v29  ;;  %v6196_v29 = vld [vmem:[#allocation19_spill] sm:$0xff] }
 0x318   : > { %3338 = vst [vmem:[%s5863_s13 + $0x30] sm:$0xff] %v3306_v9  ;;  %v3304_v38 = vmax.f32 %v3272_v25, 0.0  ;;  %v3275_v46 = vadd.f32 %v4283_v20, %v3017_v18  ;;  %v6185_v9 = vld [vmem:[#allocation20_spill] sm:$0xff]  ;;  %v6186_v25 = vld [vmem:[#allocation17_spill] sm:$0xff] }
 0x319   : > { %v3160_v62 = vpop.f32.mrf.mxu1  ;;  %v2510_v18 = vadd.f32 %v6186_v25, %v6185_v9  ;;  %v6187_v20 = vld [vmem:[#allocation49_spill] sm:$0xff]  ;;  %v6204_v9 = vld [vmem:[#allocation32_spill] sm:$0xff] }
 0x31a   : > { %3336 = vst [vmem:[%s5863_s13 + $0x20] sm:$0xff] %v3304_v38  ;;  %v3307_v4 = vmax.f32 %v3275_v46, 0.0  ;;  %v3273_v1 = vadd.f32 %v3160_v62, %v3015_v12  ;;  %v2770_v49 = vadd.f32 %v6187_v20, %v2512_v6  ;;  %v6188_v12 = vld [vmem:[#allocation64_spill] sm:$0xff]  ;;  %v6189_v62 = vld [vmem:[#allocation22_spill] sm:$0xff]  ;;  %v6205_v25 = vld [vmem:[#allocation25_spill] sm:$0xff] }
 0x31b   : > { %v4286_v63 = vpop.f32.mrf.mxu1  ;;  %v3025_v45 = vadd.f32 %v6188_v12, %v2767_v40  ;;  %v6201_v6 = vld [vmem:[#allocation30_spill] sm:$0xff]  ;;  %v6206_v20 = vld [vmem:[#allocation56_spill] sm:$0xff] }
 0x31c   : > { %3339 = vst [vmem:[%s5863_s13 + $0x38] sm:$0xff] %v3307_v4  ;;  %v3305_v54 = vmax.f32 %v3273_v1, 0.0  ;;  %v3278_v16 = vadd.f32 %v4286_v63, %v3020_v17  ;;  %v2513_v4 = vadd.f32 %v6190_v51, %v6189_v62  ;;  %v5934_v1 = vpop.f32.mrf.mxu0  ;;  %v2768_v63 = vadd.f32 %v6191_v61, %v2510_v18  ;;  %v6208_v62 = vld [vmem:[#allocation27_spill] sm:$0xff] }
 0x31d   : > { %v3173_v5 = vpop.f32.mrf.mxu1  ;;  %v2515_v18 = vadd.f32 %v6205_v25, %v6204_v9  ;;  %v6224_v25 = vld [vmem:[#allocation65_spill] sm:$0xff] }
 0x31e   : > { %3337 = vst [vmem:[%s5863_s13 + $0x28] sm:$0xff] %v3305_v54  ;;  %v3310_v43 = vmax.f32 %v3278_v16, 0.0  ;;  %v3276_v60 = vadd.f32 %v3173_v5, %v3018_v15  ;;  %v3023_v16 = vadd.f32 %v5841_v37, %v2765_v35  ;;  %v6192_v15 = vld [vmem:[#allocation24_spill] sm:$0xff]  ;;  %v3026_v48 = vadd.f32 %v5860_v14, %v2768_v63 }
 0x31f   : > { %v4287_v53 = vpop.f32.mrf.mxu1  ;;  %v2511_v5 = vadd.f32 %v6193_v32, %v6192_v15 }
 0x320   : > { %3342 = vst [vmem:[%s5863_s13 + $0x50] sm:$0xff] %v3310_v43  ;;  %v3308_v28 = vmax.f32 %v3276_v60, 0.0  ;;  %v3279_v59 = vadd.f32 %v4287_v53, %v3021_v8  ;;  %v6194_v43 = vld [vmem:[#allocation51_spill] sm:$0xff]  ;;  %v3028_v53 = vadd.f32 %v5852_v31, %v2770_v49 }
 0x321   : > { %v3176_v57 = vpop.f32.mrf.mxu1  ;;  %v2771_v60 = vadd.f32 %v6194_v43, %v2513_v4 }
 0x322   : > { %3340 = vst [vmem:[%s5863_s13 + $0x40] sm:$0xff] %v3308_v28  ;;  %v3311_v50 = vmax.f32 %v3279_v59, 0.0  ;;  %v3277_v11 = vadd.f32 %v3176_v57, %v3019_v3  ;;  %v2516_v28 = vadd.f32 %v6196_v29, %v6195_v47  ;;  %v4254_v59 = vpop.f32.mrf.mxu0  ;;  %v6197_v3 = vld [vmem:[#allocation52_spill] sm:$0xff] }
 0x323   : > { %v4290_v36 = vpop.f32.mrf.mxu1  ;;  %v2769_v44 = vadd.f32 %v6197_v3, %v2511_v5  ;;  %v6198_v57 = vld [vmem:[#allocation28_spill] sm:$0xff]  ;;  %v3029_v24 = vadd.f32 %v5874_v7, %v2771_v60  ;;  %v6212_v5 = vld [vmem:[#allocation59_spill] sm:$0xff] }
 0x324   : > { %3343 = vst [vmem:[%s5863_s13 + $0x58] sm:$0xff] %v3311_v50  ;;  %v3309_v10 = vmax.f32 %v3277_v11, 0.0  ;;  %v3282_v0 = vadd.f32 %v4290_v36, %v3024_v42  ;;  %v2514_v40 = vadd.f32 %v6199_v19, %v6198_v57  ;;  %v6200_v11 = vld [vmem:[#allocation53_spill] sm:$0xff]  ;;  %v2979_v13 = vpop.f32.mrf.mxu0  ;;  %v6202_v36 = vld [vmem:[#allocation23_spill] sm:$0xff] }
 0x325   : > { %v3189_v55 = vpop.f32.mrf.mxu1  ;;  %v2774_v26 = vadd.f32 %v6200_v11, %v2516_v28  ;;  %v2517_v23 = vadd.f32 %v6202_v36, %v6201_v6  ;;  %v6215_v28 = vld [vmem:[#allocation60_spill] sm:$0xff]  ;;  %v6221_v36 = vld [vmem:[#allocation63_spill] sm:$0xff] }
 0x326   : > { %3341 = vst [vmem:[%s5863_s13 + $0x48] sm:$0xff] %v3309_v10  ;;  %v3314_v38 = vmax.f32 %v3282_v0, 0.0  ;;  %v3280_v46 = vadd.f32 %v3189_v55, %v3022_v39  ;;  %v6203_v10 = vld [vmem:[#allocation54_spill] sm:$0xff]  ;;  %v3027_v39 = vadd.f32 %v5886_v27, %v2769_v44  ;;  %v4255_v12 = vpop.f32.mrf.mxu0 }
 0x327   : > { %v4291_v17 = vpop.f32.mrf.mxu1  ;;  %v2772_v0 = vadd.f32 %v6203_v10, %v2514_v40  ;;  %v2775_v49 = vadd.f32 %v6206_v20, %v2517_v23  ;;  %v6218_v40 = vld [vmem:[#allocation62_spill] sm:$0xff] }
 0x328   : > { %3346 = vst [vmem:[%s5863_s13 + $0x70] sm:$0xff] %v3314_v38  ;;  %v3312_v52 = vmax.f32 %v3280_v46, 0.0  ;;  %v3283_v54 = vadd.f32 %v4291_v17, %v3025_v45  ;;  %v3032_v46 = vadd.f32 %v5898_v58, %v2774_v26  ;;  %v6207_v45 = vld [vmem:[#allocation34_spill] sm:$0xff]  ;;  %v6209_v17 = vld [vmem:[#allocation57_spill] sm:$0xff] }
 0x329   : > { %v3192_v56 = vpop.f32.mrf.mxu1  ;;  %v2520_v51 = vadd.f32 %v6208_v62, %v6207_v45  ;;  %v2773_v61 = vadd.f32 %v6209_v17, %v2515_v18  ;;  %v3033_v60 = vadd.f32 %v5922_v33, %v2775_v49  ;;  %v6225_v49 = vld [vmem:[#allocation44_spill] sm:$0xff]  ;;  %v6228_v17 = vld [vmem:[#allocation43_spill] sm:$0xff] }
 0x32a   : > { %3344 = vst [vmem:[%s5863_s13 + $0x60] sm:$0xff] %v3312_v52  ;;  %v3315_v8 = vmax.f32 %v3283_v54, 0.0  ;;  %v3281_v21 = vadd.f32 %v3192_v56, %v3023_v16  ;;  %v3030_v52 = vadd.f32 %v5910_v41, %v2772_v0  ;;  %v6210_v54 = vld [vmem:[#allocation36_spill] sm:$0xff]  ;;  %v6211_v16 = vld [vmem:[#allocation29_spill] sm:$0xff]  ;;  %v6222_v0 = vld [vmem:[#allocation42_spill] sm:$0xff] }
 0x32b   : > { %v4294_v30 = vpop.f32.mrf.mxu1  ;;  %v2518_v15 = vadd.f32 %v6211_v16, %v6210_v54  ;;  %v2778_v56 = vadd.f32 %v6212_v5, %v2520_v51  ;;  %v3031_v44 = vadd.f32 %v5934_v1, %v2773_v61  ;;  %v6229_v54 = vld [vmem:[#allocation66_spill] sm:$0xff]  ;;  %v6230_v5 = vld [vmem:[#allocation67_spill] sm:$0xff] }
 0x32c   : > { %3347 = vst [vmem:[%s5863_s13 + $0x78] sm:$0xff] %v3315_v8  ;;  %v3313_v37 = vmax.f32 %v3281_v21, 0.0  ;;  %v3286_v2 = vadd.f32 %v4294_v30, %v3028_v53  ;;  %v2982_v8 = vpop.f32.mrf.mxu0  ;;  %v6213_v21 = vld [vmem:[#allocation38_spill] sm:$0xff]  ;;  %v6214_v53 = vld [vmem:[#allocation31_spill] sm:$0xff] }
 0x32d   : > { %v3205_v50 = vpop.f32.mrf.mxu1  ;;  %v2521_v47 = vadd.f32 %v6214_v53, %v6213_v21  ;;  %v2776_v30 = vadd.f32 %v6215_v28, %v2518_v15  ;;  %v3036_v26 = vadd.f32 %v4254_v59, %v2778_v56 }
 0x32e   : > { %3345 = vst [vmem:[%s5863_s13 + $0x68] sm:$0xff] %v3313_v37  ;;  %v3318_v31 = vmax.f32 %v3286_v2, 0.0  ;;  %v3284_v42 = vadd.f32 %v3205_v50, %v3026_v48  ;;  %v6216_v37 = vld [vmem:[#allocation39_spill] sm:$0xff]  ;;  %v6217_v2 = vld [vmem:[#allocation33_spill] sm:$0xff]  ;;  %v4258_v57 = vpop.f32.mrf.mxu0 }
 0x32f   : > { %v4295_v35 = vpop.f32.mrf.mxu1  ;;  %v2519_v48 = vadd.f32 %v6217_v2, %v6216_v37  ;;  %v2779_v33 = vadd.f32 %v6218_v40, %v2521_v47  ;;  %v3034_v10 = vadd.f32 %v2979_v13, %v2776_v30 }
 0x330   : > { %3350 = vst [vmem:[%s5863_s13 + $0x90] sm:$0xff] %v3318_v31  ;;  %v3316_v14 = vmax.f32 %v3284_v42, 0.0  ;;  %v3287_v22 = vadd.f32 %v4295_v35, %v3029_v24  ;;  %v6219_v31 = vld [vmem:[#allocation41_spill] sm:$0xff]  ;;  %v6220_v42 = vld [vmem:[#allocation35_spill] sm:$0xff] }
 0x331   : > { %v3208_v55 = vpop.f32.mrf.mxu1  ;;  %v2524_v24 = vadd.f32 %v6220_v42, %v6219_v31  ;;  %v2777_v23 = vadd.f32 %v6221_v36, %v2519_v48  ;;  %v3037_v20 = vadd.f32 %v4255_v12, %v2779_v33 }
 0x332   : > { %3348 = vst [vmem:[%s5863_s13 + $0x80] sm:$0xff] %v3316_v14  ;;  %v3319_v7 = vmax.f32 %v3287_v22, 0.0  ;;  %v3285_v38 = vadd.f32 %v3208_v55, %v3027_v39  ;;  %v6223_v14 = vld [vmem:[#allocation37_spill] sm:$0xff]  ;;  %v2995_v39 = vpop.f32.mrf.mxu0 }
 0x333   : > { %v4298_v4 = vpop.f32.mrf.mxu1  ;;  %v2522_v22 = vadd.f32 %v6223_v14, %v6222_v0  ;;  %v2782_v18 = vadd.f32 %v6224_v25, %v2524_v24  ;;  %v3035_v51 = vadd.f32 %v2982_v8, %v2777_v23 }
 0x334   : > { %3351 = vst [vmem:[%s5863_s13 + $0x98] sm:$0xff] %v3319_v7  ;;  %v3317_v27 = vmax.f32 %v3285_v38, 0.0  ;;  %v3290_v63 = vadd.f32 %v4298_v4, %v3032_v46  ;;  %v6226_v7 = vld [vmem:[#allocation40_spill] sm:$0xff]  ;;  %v6227_v4 = vld [vmem:[#allocation45_spill] sm:$0xff] }
 0x335   : > { %v3221_v32 = vpop.f32.mrf.mxu1  ;;  %v2525_v38 = vadd.f32 %v6226_v7, %v6225_v49  ;;  %v2780_v45 = vadd.f32 %v5837_v34, %v2522_v22  ;;  %v2523_v61 = vadd.f32 %v6228_v17, %v6227_v4 }
 0x336   : > { %3349 = vst [vmem:[%s5863_s13 + $0x88] sm:$0xff] %v3317_v27  ;;  %v3322_v58 = vmax.f32 %v3290_v63, 0.0  ;;  %v3288_v43 = vadd.f32 %v3221_v32, %v3030_v52  ;;  %v4259_v27 = vpop.f32.mrf.mxu0  ;;  %v3040_v52 = vadd.f32 %v4258_v57, %v2782_v18 }
 0x337   : > { %v4299_v29 = vpop.f32.mrf.mxu1  ;;  %v2783_v12 = vadd.f32 %v6229_v54, %v2525_v38  ;;  %v3038_v34 = vadd.f32 %v2995_v39, %v2780_v45  ;;  %v2781_v56 = vadd.f32 %v6230_v5, %v2523_v61 }
 0x338   : > { %3354 = vst [vmem:[%s5863_s13 + $0xb0] sm:$0xff] %v3322_v58  ;;  %v3320_v41 = vmax.f32 %v3288_v43, 0.0  ;;  %v3291_v3 = vadd.f32 %v4299_v29, %v3033_v60  ;;  %v2998_v60 = vpop.f32.mrf.mxu0 }
 0x339   : > { %v3224_v19 = vpop.f32.mrf.mxu1  ;;  %v3041_v21 = vadd.f32 %v4259_v27, %v2783_v12  ;;  %v3039_v28 = vadd.f32 %v2998_v60, %v2781_v56 }
 0x33a   : > { %3352 = vst [vmem:[%s5863_s13 + $0xa0] sm:$0xff] %v3320_v41  ;;  %v3323_v50 = vmax.f32 %v3291_v3, 0.0  ;;  %v3289_v11 = vadd.f32 %v3224_v19, %v3031_v44 }
 0x33b   : > { %v4302_v6 = vpop.f32.mrf.mxu1 }
 0x33c   : > { %3355 = vst [vmem:[%s5863_s13 + $0xb8] sm:$0xff] %v3323_v50  ;;  %v3321_v1 = vmax.f32 %v3289_v11, 0.0  ;;  %v3294_v35 = vadd.f32 %v4302_v6, %v3036_v26 }
 0x33d   : > { %v3237_v9 = vpop.f32.mrf.mxu1 }
 0x33e   : > { %3353 = vst [vmem:[%s5863_s13 + $0xa8] sm:$0xff] %v3321_v1  ;;  %v3326_v59 = vmax.f32 %v3294_v35, 0.0  ;;  %v3292_v55 = vadd.f32 %v3237_v9, %v3034_v10 }
 0x33f   : > { %v4303_v46 = vpop.f32.mrf.mxu1 }
 0x340   : > { %3358 = vst [vmem:[%s5863_s13 + $0xd0] sm:$0xff] %v3326_v59  ;;  %v3324_v13 = vmax.f32 %v3292_v55, 0.0  ;;  %v3295_v62 = vadd.f32 %v4303_v46, %v3037_v20 }
 0x341   : > { %v3240_v63 = vpop.f32.mrf.mxu1 }
 0x342   : > { %3356 = vst [vmem:[%s5863_s13 + $0xc0] sm:$0xff] %v3324_v13  ;;  %v3327_v16 = vmax.f32 %v3295_v62, 0.0  ;;  %v3293_v15 = vadd.f32 %v3240_v63, %v3035_v51 }
 0x343   : > { %v4306_v32 = vpop.f32.mrf.mxu1 }
 0x344   : > { %3359 = vst [vmem:[%s5863_s13 + $0xd8] sm:$0xff] %v3327_v16  ;;  %v3325_v58 = vmax.f32 %v3293_v15, 0.0  ;;  %v3298_v43 = vadd.f32 %v4306_v32, %v3040_v52 }
 0x345   : > { %v3253_v8 = vpop.f32.mrf.mxu1 }
 0x346   : > { %3357 = vst [vmem:[%s5863_s13 + $0xc8] sm:$0xff] %v3325_v58  ;;  %v3330_v53 = vmax.f32 %v3298_v43, 0.0  ;;  %v3296_v47 = vadd.f32 %v3253_v8, %v3038_v34 }
 0x347   : > { %v4307_v29 = vpop.f32.mrf.mxu1 }
 0x348   : > { %3362 = vst [vmem:[%s5863_s13 + $0xf0] sm:$0xff] %v3330_v53  ;;  %v3328_v30 = vmax.f32 %v3296_v47, 0.0  ;;  %v3299_v41 = vadd.f32 %v4307_v29, %v3041_v21 }
 0x349   : > { %v3256_v3 = vpop.f32.mrf.mxu1 }
 0x34a   : > { %3360 = vst [vmem:[%s5863_s13 + $0xe0] sm:$0xff] %v3328_v30  ;;  %v3331_v44 = vmax.f32 %v3299_v41, 0.0  ;;  %v3297_v37 = vadd.f32 %v3256_v3, %v3039_v28 }
 0x34c   : > { %3363 = vst [vmem:[%s5863_s13 + $0xf8] sm:$0xff] %v3331_v44  ;;  %v3329_v2 = vmax.f32 %v3297_v37, 0.0 }
 0x34e   : > { %3361 = vst [vmem:[%s5863_s13 + $0xe8] sm:$0xff] %v3329_v2 }
 0x34f   : > { %4601 = shalt.err (!%p4598_p3)
}
 0x350   : > { %s4602_s24 = scalar_lea.hbm %s6009_s17, 4096  ;;  %s4606_s10 = scalar_lea.hbm %s6061_s5, 8192 }
 0x351   : > { %p4603_p11 = scmp.ne.s32.totalorder %s6009_s17, %s4602_s24  ;;  %p4607_p4 = scmp.lt.s32.totalorder %s6009_s17, %s6061_s5 }
 0x352   : > { %p4608_p6 = scmp.lt.s32.totalorder %s4606_s10, %s4602_s24 }
 0x353   : > { %p4604_p9 = pnand %p4603_p11, %p6231_p2 }
 0x354   : > { %p4609_p8 = por %p4608_p6, %p4607_p4 }
 0x355   : > { %p4605_p1 = pneg %p4604_p9 }
 0x357   : > { %p4610_p5 = pnand %p4609_p8, %p4605_p1 }
 0x359   : > { %4613 = shalt.err (!%p4610_p5)
}
 0x35a   : > { %s4665_s14 = smov 128   ;;  %s4666_s28 = smov 8  }
 0x35b   : > { %4318 = dma.vmem_to_hbm [thread:$0]  (%p6231_p2), %s6011_s7, 4096, %s6009_s17, %s3365_s16, %s4665_s14, %s4665_s14, %s4666_s28  }
 0x35c PF: > { %s3393_s11 = sand.u32 1, %s4644_s18   ;;  %p6232_p7 = scmp.ne.s32.totalorder %s6083_s25, 0 }
 0x35d   : > { %p6233_p12 = scmp.ge.s32.totalorder %s4656_s21, 2  ;;  %s3394_s22 = scalar_lea.sflag [#allocation4], %s3393_s11 }
 0x35f   : > { %p4332_p13 = pnand %p6233_p12, %p6232_p7 }
 0x361   : > { %p4333_p0 = pneg %p4332_p13 }
 0x363   : > { %4639 = dma.done.wait (%p4333_p0), %s3394_s22, 4096  }
 0x364   : > { %4641 = vsyncadd (%p4333_p0), %s3394_s22, 4294963200  ;;  %p19_p10 = scmp.ge.s32.totalorder %s4775_s15, 4   ;;  %s6234_s18 = smov %s4648_s19 }
 0x365   : > { %s6235_s19 = smov %s4652_s20  ;;  %s6236_s20 = smov %s4791_s27 }
 0x366   : > { %s6237_s21 = smov %s4775_s15  ;;  %21 = sbr.rel (!%p19_p10) target bundleno = 6 (0x6), region = 101 }
 0x36b   :  { %3399 = vsyncpa [#allocation3], 1 }
 0x36c   :  { %3401 = vsyncpa [#allocation3 + $0x1], 1 }
 0x36d   :  { %3402 = vsyncpa [#allocation6], 1 }
 0x36e   :  { %3403 = vsyncpa [#allocation4], 1 }
 0x36f   :  { %3405 = vsyncpa [#allocation4 + $0x1], 1 }

</bundles_post_ra>
